<compile_context>
chip_gen: v5e
topology: v5e:2x2
jax: 0.10.0
libtpu: 0.0.40
codegen_flags: <defaults>
</compile_context>

<pallas_src>
import functools
import math

import jax
import jax.numpy as jnp
from jax.experimental import pallas as pl
from jax.experimental.pallas import tpu as pltpu


def _layernorm(x, gamma, beta, eps=1e-5):
    # x: (tq, E) f32, gamma/beta: (1, E) f32.  PyTorch nn.LayerNorm default eps=1e-5.
    mean = jnp.mean(x, axis=-1, keepdims=True)
    var = jnp.mean((x - mean) ** 2, axis=-1, keepdims=True)
    return (x - mean) * jax.lax.rsqrt(var + eps) * gamma + beta


def encoder_block_kernel(
    k_ref, q_ref, v_ref,
    wq_ref, bq_ref, wk_ref, bk_ref, wv_ref, bv_ref, wo_ref, bo_ref,
    g1_ref, be1_ref,
    w1_ref, b1_ref, w2_ref, b2_ref,
    g2_ref, be2_ref,
    out_ref,
    *, no_heads, q_tile,
):
    f32 = jnp.float32
    bf16 = jnp.bfloat16

    E = k_ref.shape[-1]
    dh = E // no_heads
    scale = 1.0 / math.sqrt(dh)

    # Load once, cast once (hoisted out of the head loop).
    k = k_ref[0].astype(bf16)          # (S,  E)
    q = q_ref[0].astype(bf16)          # (tq, E)
    v = v_ref[0].astype(bf16)          # (S,  E)

    # Residual input: the value rows aligned with this query tile (f32).
    q_start = pl.multiple_of(pl.program_id(1) * q_tile, q_tile)
    v_res = v_ref[0, pl.ds(q_start, q_tile), :]            # (tq, E) f32

    # Broadcast-style operands read once per grid step (outside the head loop).
    bo = bo_ref[...]
    g1, be1 = g1_ref[...], be1_ref[...]
    g2, be2 = g2_ref[...], be2_ref[...]
    b1, b2 = b1_ref[...], b2_ref[...]

    # ---- Multi-head attention ------------------------------------------------
    # Accumulator starts at the output-projection bias (broadcast over rows).
    acc = jnp.broadcast_to(bo, (q_tile, E)).astype(f32)
    for h in range(no_heads):
        Qh = (jnp.dot(q, wq_ref[h], preferred_element_type=f32) + bq_ref[h]) * scale  # (tq, dh)
        Kh = jnp.dot(k, wk_ref[h], preferred_element_type=f32) + bk_ref[h]            # (S,  dh)
        Vh = jnp.dot(v, wv_ref[h], preferred_element_type=f32) + bv_ref[h]            # (S,  dh)

        # scores = Qh @ Kh^T without materializing the transpose.
        s = jax.lax.dot_general(
            Qh.astype(bf16), Kh.astype(bf16),
            dimension_numbers=(((1,), (1,)), ((), ())),
            preferred_element_type=f32)                                               # (tq, S)

        m = jnp.max(s, axis=-1, keepdims=True)
        e = jnp.exp(s - m)
        p = e * pl.reciprocal(jnp.sum(e, axis=-1, keepdims=True), approx=True)        # softmax

        ctx = jnp.dot(p.astype(bf16), Vh.astype(bf16), preferred_element_type=f32)    # (tq, dh)

        # Fold this head's slice of the output projection; accumulate full width.
        acc = acc + jnp.dot(ctx.astype(bf16), wo_ref[h], preferred_element_type=f32)  # (tq, E)

    attn_out = acc

    # ---- Residual (on `value`, as in the PyTorch forward) + LayerNorm --------
    # TODO(synk): dropout1/dropout2 are identity here (eval mode, no RNG).
    x1 = v_res + attn_out
    ln1 = _layernorm(x1, g1, be1)

    # ---- Feed-forward ---------------------------------------------------------
    h1 = jnp.dot(ln1.astype(bf16), w1_ref[...], preferred_element_type=f32) + b1
    h1 = jnp.maximum(h1, 0.0)                                                          # ReLU
    ffn = jnp.dot(h1.astype(bf16), w2_ref[...], preferred_element_type=f32) + b2

    # ---- Residual + LayerNorm -------------------------------------------------
    x2 = ln1 + ffn
    out_ref[0] = _layernorm(x2, g2, be2).astype(out_ref.dtype)


def encoder_block(key_t, query_t, value_t, params, *, no_heads, q_tile=None):
    B, S, E = key_t.shape
    Sq = query_t.shape[1]
    assert E % no_heads == 0
    dh = E // no_heads
    assert Sq == value_t.shape[1], "residual (value + attn) requires Sq == S"

    if q_tile is None:
        q_tile = Sq if Sq <= 128 else 128
    assert Sq % q_tile == 0
    n_q = Sq // q_tile

    bf16 = jnp.bfloat16

    # Pre-split projection weights head-major (plain XLA, outside kernel) and
    # store matmul weights as bf16 (f32 accumulation happens on the MXU).
    def split_in(w):      # (E, E=H*dh) -> (H, E, dh)
        return jnp.transpose(w.reshape(E, no_heads, dh), (1, 0, 2)).astype(bf16)

    def split_bias(b):    # (1, E) -> (H, 1, dh), kept f32
        return jnp.transpose(b.reshape(1, no_heads, dh), (1, 0, 2))

    wq_h, wk_h, wv_h = (split_in(params[n]) for n in ("wq", "wk", "wv"))
    bq_h, bk_h, bv_h = (split_bias(params[n]) for n in ("bq", "bk", "bv"))
    wo_h = params["wo"].reshape(no_heads, dh, E).astype(bf16)      # (H, dh, E)
    w1 = params["w1"].astype(bf16)
    w2 = params["w2"].astype(bf16)

    weight_args = (
        wq_h, bq_h, wk_h, bk_h, wv_h, bv_h, wo_h, params["bo"],
        params["g1"], params["be1"],
        w1, params["b1"], w2, params["b2"],
        params["g2"], params["be2"],
    )

    def full_spec(arr):
        nd = arr.ndim
        return pl.BlockSpec(arr.shape, lambda b, qi, _nd=nd: (0,) * _nd)

    in_specs = [
        pl.BlockSpec((1, S, E), lambda b, qi: (b, 0, 0)),        # key   (full seq)
        pl.BlockSpec((1, q_tile, E), lambda b, qi: (b, qi, 0)),  # query (seq-tiled)
        pl.BlockSpec((1, S, E), lambda b, qi: (b, 0, 0)),        # value (full seq)
    ] + [full_spec(w) for w in weight_args]

    return pl.pallas_call(
        functools.partial(encoder_block_kernel, no_heads=no_heads, q_tile=q_tile),
        out_shape=jax.ShapeDtypeStruct((B, Sq, E), jnp.float32),
        grid_spec=pltpu.PrefetchScalarGridSpec(
            num_scalar_prefetch=0,
            grid=(B, n_q),
            in_specs=in_specs,
            out_specs=pl.BlockSpec((1, q_tile, E), lambda b, qi: (b, qi, 0)),
        ),
        compiler_params=pltpu.CompilerParams(
            dimension_semantics=("parallel", "parallel"),
        ),
    )(key_t, query_t, value_t, *weight_args)


def init_params(rng, embedding_dim, expansion_factor):
    E = embedding_dim
    H = E * expansion_factor
    keys = jax.random.split(rng, 6)

    def lin(k, fan_in, fan_out):
        scale = 1.0 / math.sqrt(fan_in)
        w = jax.random.uniform(k, (fan_in, fan_out), jnp.float32, -scale, scale)
        b = jnp.zeros((1, fan_out), jnp.float32)
        return w, b

    wq, bq = lin(keys[0], E, E)
    wk, bk = lin(keys[1], E, E)
    wv, bv = lin(keys[2], E, E)
    wo, bo = lin(keys[3], E, E)
    w1, b1 = lin(keys[4], E, H)
    w2, b2 = lin(keys[5], H, E)
    return dict(
        wq=wq, bq=bq, wk=wk, bk=bk, wv=wv, bv=bv, wo=wo, bo=bo,
        g1=jnp.ones((1, E), jnp.float32), be1=jnp.zeros((1, E), jnp.float32),
        w1=w1, b1=b1, w2=w2, b2=b2,
        g2=jnp.ones((1, E), jnp.float32), be2=jnp.zeros((1, E), jnp.float32),
    )


if __name__ == "__main__":
    # Small but lane-dense config: E = 128 keeps every store unmasked (full lanes).
    B, S, E = 2, 8, 128
    NO_HEADS = 4
    EXPANSION = 4

    root = jax.random.PRNGKey(0)
    k_in, k_par = jax.random.split(root)
    kk, kq, kv = jax.random.split(k_in, 3)

    # Self-attention style inputs: key/query/value all [B, S, E].
    key_t = jax.random.normal(kk, (B, S, E), jnp.float32)
    query_t = jax.random.normal(kq, (B, S, E), jnp.float32)
    value_t = jax.random.normal(kv, (B, S, E), jnp.float32)

    params = init_params(k_par, E, EXPANSION)

    out = encoder_block(key_t, query_t, value_t, params, no_heads=NO_HEADS)
    out = jax.block_until_ready(out)
    assert out.shape == (B, S, E)
    assert bool(jnp.all(jnp.isfinite(out)))
    print("KERNEL_OK")
</pallas_src>

<mosaic_0001>
module attributes {stable_mosaic.version = 11 : i64} {
  func.func @encoder_block_kernel(%arg0: i32, %arg1: i32, %arg2: memref<1x8x128xf32, #tpu.memory_space<vmem>>, %arg3: memref<1x8x128xf32, #tpu.memory_space<vmem>>, %arg4: memref<1x8x128xf32, #tpu.memory_space<vmem>>, %arg5: memref<4x128x32xbf16, #tpu.memory_space<vmem>>, %arg6: memref<4x1x32xf32, #tpu.memory_space<vmem>>, %arg7: memref<4x128x32xbf16, #tpu.memory_space<vmem>>, %arg8: memref<4x1x32xf32, #tpu.memory_space<vmem>>, %arg9: memref<4x128x32xbf16, #tpu.memory_space<vmem>>, %arg10: memref<4x1x32xf32, #tpu.memory_space<vmem>>, %arg11: memref<4x32x128xbf16, #tpu.memory_space<vmem>>, %arg12: memref<1x128xf32, #tpu.memory_space<vmem>>, %arg13: memref<1x128xf32, #tpu.memory_space<vmem>>, %arg14: memref<1x128xf32, #tpu.memory_space<vmem>>, %arg15: memref<128x512xbf16, #tpu.memory_space<vmem>>, %arg16: memref<1x512xf32, #tpu.memory_space<vmem>>, %arg17: memref<512x128xbf16, #tpu.memory_space<vmem>>, %arg18: memref<1x128xf32, #tpu.memory_space<vmem>>, %arg19: memref<1x128xf32, #tpu.memory_space<vmem>>, %arg20: memref<1x128xf32, #tpu.memory_space<vmem>>, %arg21: memref<1x8x128xf32, #tpu.memory_space<vmem>>) attributes {dimension_semantics = [#tpu.dimension_semantics<parallel>, #tpu.dimension_semantics<parallel>], iteration_bounds = array<i64: 2, 1>, scalar_prefetch = 0 : i64, scratch_operands = 0 : i64, tpu.core_type = #tpu.core_type<tc>, window_params = [{transform_indices = @transform_0, window_bounds = array<i64: 1, 8, 128>}, {transform_indices = @transform_1, window_bounds = array<i64: 1, 8, 128>}, {transform_indices = @transform_2, window_bounds = array<i64: 1, 8, 128>}, {pipeline_mode = #tpu.pipeline_mode<synchronous>, transform_indices = @transform_3, window_bounds = array<i64: 4, 128, 32>}, {pipeline_mode = #tpu.pipeline_mode<synchronous>, transform_indices = @transform_4, window_bounds = array<i64: 4, 1, 32>}, {pipeline_mode = #tpu.pipeline_mode<synchronous>, transform_indices = @transform_5, window_bounds = array<i64: 4, 128, 32>}, {pipeline_mode = #tpu.pipeline_mode<synchronous>, transform_indices = @transform_6, window_bounds = array<i64: 4, 1, 32>}, {pipeline_mode = #tpu.pipeline_mode<synchronous>, transform_indices = @transform_7, window_bounds = array<i64: 4, 128, 32>}, {pipeline_mode = #tpu.pipeline_mode<synchronous>, transform_indices = @transform_8, window_bounds = array<i64: 4, 1, 32>}, {pipeline_mode = #tpu.pipeline_mode<synchronous>, transform_indices = @transform_9, window_bounds = array<i64: 4, 32, 128>}, {pipeline_mode = #tpu.pipeline_mode<synchronous>, transform_indices = @transform_10, window_bounds = array<i64: 1, 128>}, {pipeline_mode = #tpu.pipeline_mode<synchronous>, transform_indices = @transform_11, window_bounds = array<i64: 1, 128>}, {pipeline_mode = #tpu.pipeline_mode<synchronous>, transform_indices = @transform_12, window_bounds = array<i64: 1, 128>}, {pipeline_mode = #tpu.pipeline_mode<synchronous>, transform_indices = @transform_13, window_bounds = array<i64: 128, 512>}, {pipeline_mode = #tpu.pipeline_mode<synchronous>, transform_indices = @transform_14, window_bounds = array<i64: 1, 512>}, {pipeline_mode = #tpu.pipeline_mode<synchronous>, transform_indices = @transform_15, window_bounds = array<i64: 512, 128>}, {pipeline_mode = #tpu.pipeline_mode<synchronous>, transform_indices = @transform_16, window_bounds = array<i64: 1, 128>}, {pipeline_mode = #tpu.pipeline_mode<synchronous>, transform_indices = @transform_17, window_bounds = array<i64: 1, 128>}, {pipeline_mode = #tpu.pipeline_mode<synchronous>, transform_indices = @transform_18, window_bounds = array<i64: 1, 128>}, {transform_indices = @transform_19, window_bounds = array<i64: 1, 8, 128>}]} {
    %c0 = arith.constant 0 : index
    %c0_0 = arith.constant 0 : index
    %c0_1 = arith.constant 0 : index
    %0 = vector.load %arg2[%c0, %c0_0, %c0_1] : memref<1x8x128xf32, #tpu.memory_space<vmem>>, vector<1x8x128xf32>
    %1 = vector.shape_cast %0 : vector<1x8x128xf32> to vector<8x128xf32>
    %2 = arith.truncf %1 : vector<8x128xf32> to vector<8x128xbf16>
    %c0_2 = arith.constant 0 : index
    %c0_3 = arith.constant 0 : index
    %c0_4 = arith.constant 0 : index
    %3 = vector.load %arg3[%c0_2, %c0_3, %c0_4] : memref<1x8x128xf32, #tpu.memory_space<vmem>>, vector<1x8x128xf32>
    %4 = vector.shape_cast %3 : vector<1x8x128xf32> to vector<8x128xf32>
    %5 = arith.truncf %4 : vector<8x128xf32> to vector<8x128xbf16>
    %c0_5 = arith.constant 0 : index
    %c0_6 = arith.constant 0 : index
    %c0_7 = arith.constant 0 : index
    %6 = vector.load %arg4[%c0_5, %c0_6, %c0_7] : memref<1x8x128xf32, #tpu.memory_space<vmem>>, vector<1x8x128xf32>
    %7 = vector.shape_cast %6 : vector<1x8x128xf32> to vector<8x128xf32>
    %8 = arith.truncf %7 : vector<8x128xf32> to vector<8x128xbf16>
    %c8_i32 = arith.constant 8 : i32
    %9 = arith.muli %arg1, %c8_i32 : i32
    %10 = tpu.assume_multiple %9, 8 : i32
    %c0_8 = arith.constant 0 : index
    %11 = arith.index_cast %10 : i32 to index
    %c0_9 = arith.constant 0 : index
    %12 = vector.load %arg4[%c0_8, %11, %c0_9] : memref<1x8x128xf32, #tpu.memory_space<vmem>>, vector<1x8x128xf32>
    %13 = vector.shape_cast %12 : vector<1x8x128xf32> to vector<8x128xf32>
    %c0_10 = arith.constant 0 : index
    %c0_11 = arith.constant 0 : index
    %14 = vector.load %arg12[%c0_10, %c0_11] : memref<1x128xf32, #tpu.memory_space<vmem>>, vector<1x128xf32>
    %c0_12 = arith.constant 0 : index
    %c0_13 = arith.constant 0 : index
    %15 = vector.load %arg13[%c0_12, %c0_13] : memref<1x128xf32, #tpu.memory_space<vmem>>, vector<1x128xf32>
    %c0_14 = arith.constant 0 : index
    %c0_15 = arith.constant 0 : index
    %16 = vector.load %arg14[%c0_14, %c0_15] : memref<1x128xf32, #tpu.memory_space<vmem>>, vector<1x128xf32>
    %c0_16 = arith.constant 0 : index
    %c0_17 = arith.constant 0 : index
    %17 = vector.load %arg19[%c0_16, %c0_17] : memref<1x128xf32, #tpu.memory_space<vmem>>, vector<1x128xf32>
    %c0_18 = arith.constant 0 : index
    %c0_19 = arith.constant 0 : index
    %18 = vector.load %arg20[%c0_18, %c0_19] : memref<1x128xf32, #tpu.memory_space<vmem>>, vector<1x128xf32>
    %c0_20 = arith.constant 0 : index
    %c0_21 = arith.constant 0 : index
    %19 = vector.load %arg16[%c0_20, %c0_21] : memref<1x512xf32, #tpu.memory_space<vmem>>, vector<1x512xf32>
    %c0_22 = arith.constant 0 : index
    %c0_23 = arith.constant 0 : index
    %20 = vector.load %arg18[%c0_22, %c0_23] : memref<1x128xf32, #tpu.memory_space<vmem>>, vector<1x128xf32>
    %21 = vector.shape_cast %14 : vector<1x128xf32> to vector<1x128xf32>
    %22 = vector.broadcast %21 : vector<1x128xf32> to vector<8x128xf32>
    %c0_24 = arith.constant 0 : index
    %c0_25 = arith.constant 0 : index
    %c0_26 = arith.constant 0 : index
    %23 = vector.load %arg5[%c0_24, %c0_25, %c0_26] : memref<4x128x32xbf16, #tpu.memory_space<vmem>>, vector<1x128x32xbf16>
    %24 = vector.shape_cast %23 : vector<1x128x32xbf16> to vector<128x32xbf16>
    %cst = arith.constant dense<0.000000e+00> : vector<8x32xf32>
    %25 = tpu.matmul %5, %24, %cst {dimension_numbers = #tpu.dot_dimension_numbers<[1], [0], [0], [1], [0, 0, 1, 1], [], []>} : vector<8x128xbf16>, vector<128x32xbf16>, vector<8x32xf32> -> vector<8x32xf32>
    %c0_27 = arith.constant 0 : index
    %c0_28 = arith.constant 0 : index
    %c0_29 = arith.constant 0 : index
    %26 = vector.load %arg6[%c0_27, %c0_28, %c0_29] : memref<4x1x32xf32, #tpu.memory_space<vmem>>, vector<1x1x32xf32>
    %27 = vector.shape_cast %26 : vector<1x1x32xf32> to vector<1x32xf32>
    %28 = vector.broadcast %27 : vector<1x32xf32> to vector<8x32xf32>
    %29 = arith.addf %25, %28 : vector<8x32xf32>
    %cst_30 = arith.constant 0.176776692 : f32
    %30 = vector.broadcast %cst_30 : f32 to vector<8x32xf32>
    %31 = arith.mulf %29, %30 : vector<8x32xf32>
    %c0_31 = arith.constant 0 : index
    %c0_32 = arith.constant 0 : index
    %c0_33 = arith.constant 0 : index
    %32 = vector.load %arg7[%c0_31, %c0_32, %c0_33] : memref<4x128x32xbf16, #tpu.memory_space<vmem>>, vector<1x128x32xbf16>
    %33 = vector.shape_cast %32 : vector<1x128x32xbf16> to vector<128x32xbf16>
    %cst_34 = arith.constant dense<0.000000e+00> : vector<8x32xf32>
    %34 = tpu.matmul %2, %33, %cst_34 {dimension_numbers = #tpu.dot_dimension_numbers<[1], [0], [0], [1], [0, 0, 1, 1], [], []>} : vector<8x128xbf16>, vector<128x32xbf16>, vector<8x32xf32> -> vector<8x32xf32>
    %c0_35 = arith.constant 0 : index
    %c0_36 = arith.constant 0 : index
    %c0_37 = arith.constant 0 : index
    %35 = vector.load %arg8[%c0_35, %c0_36, %c0_37] : memref<4x1x32xf32, #tpu.memory_space<vmem>>, vector<1x1x32xf32>
    %36 = vector.shape_cast %35 : vector<1x1x32xf32> to vector<1x32xf32>
    %37 = vector.broadcast %36 : vector<1x32xf32> to vector<8x32xf32>
    %38 = arith.addf %34, %37 : vector<8x32xf32>
    %c0_38 = arith.constant 0 : index
    %c0_39 = arith.constant 0 : index
    %c0_40 = arith.constant 0 : index
    %39 = vector.load %arg9[%c0_38, %c0_39, %c0_40] : memref<4x128x32xbf16, #tpu.memory_space<vmem>>, vector<1x128x32xbf16>
    %40 = vector.shape_cast %39 : vector<1x128x32xbf16> to vector<128x32xbf16>
    %cst_41 = arith.constant dense<0.000000e+00> : vector<8x32xf32>
    %41 = tpu.matmul %8, %40, %cst_41 {dimension_numbers = #tpu.dot_dimension_numbers<[1], [0], [0], [1], [0, 0, 1, 1], [], []>} : vector<8x128xbf16>, vector<128x32xbf16>, vector<8x32xf32> -> vector<8x32xf32>
    %c0_42 = arith.constant 0 : index
    %c0_43 = arith.constant 0 : index
    %c0_44 = arith.constant 0 : index
    %42 = vector.load %arg10[%c0_42, %c0_43, %c0_44] : memref<4x1x32xf32, #tpu.memory_space<vmem>>, vector<1x1x32xf32>
    %43 = vector.shape_cast %42 : vector<1x1x32xf32> to vector<1x32xf32>
    %44 = vector.broadcast %43 : vector<1x32xf32> to vector<8x32xf32>
    %45 = arith.addf %41, %44 : vector<8x32xf32>
    %46 = arith.truncf %31 : vector<8x32xf32> to vector<8x32xbf16>
    %47 = arith.truncf %38 : vector<8x32xf32> to vector<8x32xbf16>
    %cst_45 = arith.constant dense<0.000000e+00> : vector<8x8xf32>
    %48 = tpu.matmul %46, %47, %cst_45 {dimension_numbers = #tpu.dot_dimension_numbers<[1], [1], [0], [0], [0, 0, 1, 0], [], []>} : vector<8x32xbf16>, vector<8x32xbf16>, vector<8x8xf32> -> vector<8x8xf32>
    %cst_46 = arith.constant dense<0xFF800000> : vector<8xf32>
    %49 = vector.multi_reduction <maximumf>, %48, %cst_46 [1] : vector<8x8xf32> to vector<8xf32>
    %50 = vector.shape_cast %49 : vector<8xf32> to vector<8x1xf32>
    %51 = vector.broadcast %50 : vector<8x1xf32> to vector<8x8xf32>
    %52 = arith.subf %48, %51 : vector<8x8xf32>
    %53 = math.exp %52 : vector<8x8xf32>
    %cst_47 = arith.constant dense<0.000000e+00> : vector<8xf32>
    %54 = vector.multi_reduction <add>, %53, %cst_47 [1] : vector<8x8xf32> to vector<8xf32>
    %55 = vector.shape_cast %54 : vector<8xf32> to vector<8x1xf32>
    %56 = tpu.reciprocal %55 {approx = true} : vector<8x1xf32> -> vector<8x1xf32>
    %57 = vector.broadcast %56 : vector<8x1xf32> to vector<8x8xf32>
    %58 = arith.mulf %53, %57 : vector<8x8xf32>
    %59 = arith.truncf %58 : vector<8x8xf32> to vector<8x8xbf16>
    %60 = arith.truncf %45 : vector<8x32xf32> to vector<8x32xbf16>
    %cst_48 = arith.constant dense<0.000000e+00> : vector<8x32xf32>
    %61 = tpu.matmul %59, %60, %cst_48 {dimension_numbers = #tpu.dot_dimension_numbers<[1], [0], [0], [1], [0, 0, 1, 1], [], []>} : vector<8x8xbf16>, vector<8x32xbf16>, vector<8x32xf32> -> vector<8x32xf32>
    %62 = arith.truncf %61 : vector<8x32xf32> to vector<8x32xbf16>
    %c0_49 = arith.constant 0 : index
    %c0_50 = arith.constant 0 : index
    %c0_51 = arith.constant 0 : index
    %63 = vector.load %arg11[%c0_49, %c0_50, %c0_51] : memref<4x32x128xbf16, #tpu.memory_space<vmem>>, vector<1x32x128xbf16>
    %64 = vector.shape_cast %63 : vector<1x32x128xbf16> to vector<32x128xbf16>
    %cst_52 = arith.constant dense<0.000000e+00> : vector<8x128xf32>
    %65 = tpu.matmul %62, %64, %cst_52 {dimension_numbers = #tpu.dot_dimension_numbers<[1], [0], [0], [1], [0, 0, 1, 1], [], []>} : vector<8x32xbf16>, vector<32x128xbf16>, vector<8x128xf32> -> vector<8x128xf32>
    %66 = arith.addf %22, %65 : vector<8x128xf32>
    %c1 = arith.constant 1 : index
    %c0_53 = arith.constant 0 : index
    %c0_54 = arith.constant 0 : index
    %67 = vector.load %arg5[%c1, %c0_53, %c0_54] : memref<4x128x32xbf16, #tpu.memory_space<vmem>>, vector<1x128x32xbf16>
    %68 = vector.shape_cast %67 : vector<1x128x32xbf16> to vector<128x32xbf16>
    %cst_55 = arith.constant dense<0.000000e+00> : vector<8x32xf32>
    %69 = tpu.matmul %5, %68, %cst_55 {dimension_numbers = #tpu.dot_dimension_numbers<[1], [0], [0], [1], [0, 0, 1, 1], [], []>} : vector<8x128xbf16>, vector<128x32xbf16>, vector<8x32xf32> -> vector<8x32xf32>
    %c1_56 = arith.constant 1 : index
    %c0_57 = arith.constant 0 : index
    %c0_58 = arith.constant 0 : index
    %70 = vector.load %arg6[%c1_56, %c0_57, %c0_58] : memref<4x1x32xf32, #tpu.memory_space<vmem>>, vector<1x1x32xf32>
    %71 = vector.shape_cast %70 : vector<1x1x32xf32> to vector<1x32xf32>
    %72 = vector.broadcast %71 : vector<1x32xf32> to vector<8x32xf32>
    %73 = arith.addf %69, %72 : vector<8x32xf32>
    %cst_59 = arith.constant 0.176776692 : f32
    %74 = vector.broadcast %cst_59 : f32 to vector<8x32xf32>
    %75 = arith.mulf %73, %74 : vector<8x32xf32>
    %c1_60 = arith.constant 1 : index
    %c0_61 = arith.constant 0 : index
    %c0_62 = arith.constant 0 : index
    %76 = vector.load %arg7[%c1_60, %c0_61, %c0_62] : memref<4x128x32xbf16, #tpu.memory_space<vmem>>, vector<1x128x32xbf16>
    %77 = vector.shape_cast %76 : vector<1x128x32xbf16> to vector<128x32xbf16>
    %cst_63 = arith.constant dense<0.000000e+00> : vector<8x32xf32>
    %78 = tpu.matmul %2, %77, %cst_63 {dimension_numbers = #tpu.dot_dimension_numbers<[1], [0], [0], [1], [0, 0, 1, 1], [], []>} : vector<8x128xbf16>, vector<128x32xbf16>, vector<8x32xf32> -> vector<8x32xf32>
    %c1_64 = arith.constant 1 : index
    %c0_65 = arith.constant 0 : index
    %c0_66 = arith.constant 0 : index
    %79 = vector.load %arg8[%c1_64, %c0_65, %c0_66] : memref<4x1x32xf32, #tpu.memory_space<vmem>>, vector<1x1x32xf32>
    %80 = vector.shape_cast %79 : vector<1x1x32xf32> to vector<1x32xf32>
    %81 = vector.broadcast %80 : vector<1x32xf32> to vector<8x32xf32>
    %82 = arith.addf %78, %81 : vector<8x32xf32>
    %c1_67 = arith.constant 1 : index
    %c0_68 = arith.constant 0 : index
    %c0_69 = arith.constant 0 : index
    %83 = vector.load %arg9[%c1_67, %c0_68, %c0_69] : memref<4x128x32xbf16, #tpu.memory_space<vmem>>, vector<1x128x32xbf16>
    %84 = vector.shape_cast %83 : vector<1x128x32xbf16> to vector<128x32xbf16>
    %cst_70 = arith.constant dense<0.000000e+00> : vector<8x32xf32>
    %85 = tpu.matmul %8, %84, %cst_70 {dimension_numbers = #tpu.dot_dimension_numbers<[1], [0], [0], [1], [0, 0, 1, 1], [], []>} : vector<8x128xbf16>, vector<128x32xbf16>, vector<8x32xf32> -> vector<8x32xf32>
    %c1_71 = arith.constant 1 : index
    %c0_72 = arith.constant 0 : index
    %c0_73 = arith.constant 0 : index
    %86 = vector.load %arg10[%c1_71, %c0_72, %c0_73] : memref<4x1x32xf32, #tpu.memory_space<vmem>>, vector<1x1x32xf32>
    %87 = vector.shape_cast %86 : vector<1x1x32xf32> to vector<1x32xf32>
    %88 = vector.broadcast %87 : vector<1x32xf32> to vector<8x32xf32>
    %89 = arith.addf %85, %88 : vector<8x32xf32>
    %90 = arith.truncf %75 : vector<8x32xf32> to vector<8x32xbf16>
    %91 = arith.truncf %82 : vector<8x32xf32> to vector<8x32xbf16>
    %cst_74 = arith.constant dense<0.000000e+00> : vector<8x8xf32>
    %92 = tpu.matmul %90, %91, %cst_74 {dimension_numbers = #tpu.dot_dimension_numbers<[1], [1], [0], [0], [0, 0, 1, 0], [], []>} : vector<8x32xbf16>, vector<8x32xbf16>, vector<8x8xf32> -> vector<8x8xf32>
    %cst_75 = arith.constant dense<0xFF800000> : vector<8xf32>
    %93 = vector.multi_reduction <maximumf>, %92, %cst_75 [1] : vector<8x8xf32> to vector<8xf32>
    %94 = vector.shape_cast %93 : vector<8xf32> to vector<8x1xf32>
    %95 = vector.broadcast %94 : vector<8x1xf32> to vector<8x8xf32>
    %96 = arith.subf %92, %95 : vector<8x8xf32>
    %97 = math.exp %96 : vector<8x8xf32>
    %cst_76 = arith.constant dense<0.000000e+00> : vector<8xf32>
    %98 = vector.multi_reduction <add>, %97, %cst_76 [1] : vector<8x8xf32> to vector<8xf32>
    %99 = vector.shape_cast %98 : vector<8xf32> to vector<8x1xf32>
    %100 = tpu.reciprocal %99 {approx = true} : vector<8x1xf32> -> vector<8x1xf32>
    %101 = vector.broadcast %100 : vector<8x1xf32> to vector<8x8xf32>
    %102 = arith.mulf %97, %101 : vector<8x8xf32>
    %103 = arith.truncf %102 : vector<8x8xf32> to vector<8x8xbf16>
    %104 = arith.truncf %89 : vector<8x32xf32> to vector<8x32xbf16>
    %cst_77 = arith.constant dense<0.000000e+00> : vector<8x32xf32>
    %105 = tpu.matmul %103, %104, %cst_77 {dimension_numbers = #tpu.dot_dimension_numbers<[1], [0], [0], [1], [0, 0, 1, 1], [], []>} : vector<8x8xbf16>, vector<8x32xbf16>, vector<8x32xf32> -> vector<8x32xf32>
    %106 = arith.truncf %105 : vector<8x32xf32> to vector<8x32xbf16>
    %c1_78 = arith.constant 1 : index
    %c0_79 = arith.constant 0 : index
    %c0_80 = arith.constant 0 : index
    %107 = vector.load %arg11[%c1_78, %c0_79, %c0_80] : memref<4x32x128xbf16, #tpu.memory_space<vmem>>, vector<1x32x128xbf16>
    %108 = vector.shape_cast %107 : vector<1x32x128xbf16> to vector<32x128xbf16>
    %cst_81 = arith.constant dense<0.000000e+00> : vector<8x128xf32>
    %109 = tpu.matmul %106, %108, %cst_81 {dimension_numbers = #tpu.dot_dimension_numbers<[1], [0], [0], [1], [0, 0, 1, 1], [], []>} : vector<8x32xbf16>, vector<32x128xbf16>, vector<8x128xf32> -> vector<8x128xf32>
    %110 = arith.addf %66, %109 : vector<8x128xf32>
    %c2 = arith.constant 2 : index
    %c0_82 = arith.constant 0 : index
    %c0_83 = arith.constant 0 : index
    %111 = vector.load %arg5[%c2, %c0_82, %c0_83] : memref<4x128x32xbf16, #tpu.memory_space<vmem>>, vector<1x128x32xbf16>
    %112 = vector.shape_cast %111 : vector<1x128x32xbf16> to vector<128x32xbf16>
    %cst_84 = arith.constant dense<0.000000e+00> : vector<8x32xf32>
    %113 = tpu.matmul %5, %112, %cst_84 {dimension_numbers = #tpu.dot_dimension_numbers<[1], [0], [0], [1], [0, 0, 1, 1], [], []>} : vector<8x128xbf16>, vector<128x32xbf16>, vector<8x32xf32> -> vector<8x32xf32>
    %c2_85 = arith.constant 2 : index
    %c0_86 = arith.constant 0 : index
    %c0_87 = arith.constant 0 : index
    %114 = vector.load %arg6[%c2_85, %c0_86, %c0_87] : memref<4x1x32xf32, #tpu.memory_space<vmem>>, vector<1x1x32xf32>
    %115 = vector.shape_cast %114 : vector<1x1x32xf32> to vector<1x32xf32>
    %116 = vector.broadcast %115 : vector<1x32xf32> to vector<8x32xf32>
    %117 = arith.addf %113, %116 : vector<8x32xf32>
    %cst_88 = arith.constant 0.176776692 : f32
    %118 = vector.broadcast %cst_88 : f32 to vector<8x32xf32>
    %119 = arith.mulf %117, %118 : vector<8x32xf32>
    %c2_89 = arith.constant 2 : index
    %c0_90 = arith.constant 0 : index
    %c0_91 = arith.constant 0 : index
    %120 = vector.load %arg7[%c2_89, %c0_90, %c0_91] : memref<4x128x32xbf16, #tpu.memory_space<vmem>>, vector<1x128x32xbf16>
    %121 = vector.shape_cast %120 : vector<1x128x32xbf16> to vector<128x32xbf16>
    %cst_92 = arith.constant dense<0.000000e+00> : vector<8x32xf32>
    %122 = tpu.matmul %2, %121, %cst_92 {dimension_numbers = #tpu.dot_dimension_numbers<[1], [0], [0], [1], [0, 0, 1, 1], [], []>} : vector<8x128xbf16>, vector<128x32xbf16>, vector<8x32xf32> -> vector<8x32xf32>
    %c2_93 = arith.constant 2 : index
    %c0_94 = arith.constant 0 : index
    %c0_95 = arith.constant 0 : index
    %123 = vector.load %arg8[%c2_93, %c0_94, %c0_95] : memref<4x1x32xf32, #tpu.memory_space<vmem>>, vector<1x1x32xf32>
    %124 = vector.shape_cast %123 : vector<1x1x32xf32> to vector<1x32xf32>
    %125 = vector.broadcast %124 : vector<1x32xf32> to vector<8x32xf32>
    %126 = arith.addf %122, %125 : vector<8x32xf32>
    %c2_96 = arith.constant 2 : index
    %c0_97 = arith.constant 0 : index
    %c0_98 = arith.constant 0 : index
    %127 = vector.load %arg9[%c2_96, %c0_97, %c0_98] : memref<4x128x32xbf16, #tpu.memory_space<vmem>>, vector<1x128x32xbf16>
    %128 = vector.shape_cast %127 : vector<1x128x32xbf16> to vector<128x32xbf16>
    %cst_99 = arith.constant dense<0.000000e+00> : vector<8x32xf32>
    %129 = tpu.matmul %8, %128, %cst_99 {dimension_numbers = #tpu.dot_dimension_numbers<[1], [0], [0], [1], [0, 0, 1, 1], [], []>} : vector<8x128xbf16>, vector<128x32xbf16>, vector<8x32xf32> -> vector<8x32xf32>
    %c2_100 = arith.constant 2 : index
    %c0_101 = arith.constant 0 : index
    %c0_102 = arith.constant 0 : index
    %130 = vector.load %arg10[%c2_100, %c0_101, %c0_102] : memref<4x1x32xf32, #tpu.memory_space<vmem>>, vector<1x1x32xf32>
    %131 = vector.shape_cast %130 : vector<1x1x32xf32> to vector<1x32xf32>
    %132 = vector.broadcast %131 : vector<1x32xf32> to vector<8x32xf32>
    %133 = arith.addf %129, %132 : vector<8x32xf32>
    %134 = arith.truncf %119 : vector<8x32xf32> to vector<8x32xbf16>
    %135 = arith.truncf %126 : vector<8x32xf32> to vector<8x32xbf16>
    %cst_103 = arith.constant dense<0.000000e+00> : vector<8x8xf32>
    %136 = tpu.matmul %134, %135, %cst_103 {dimension_numbers = #tpu.dot_dimension_numbers<[1], [1], [0], [0], [0, 0, 1, 0], [], []>} : vector<8x32xbf16>, vector<8x32xbf16>, vector<8x8xf32> -> vector<8x8xf32>
    %cst_104 = arith.constant dense<0xFF800000> : vector<8xf32>
    %137 = vector.multi_reduction <maximumf>, %136, %cst_104 [1] : vector<8x8xf32> to vector<8xf32>
    %138 = vector.shape_cast %137 : vector<8xf32> to vector<8x1xf32>
    %139 = vector.broadcast %138 : vector<8x1xf32> to vector<8x8xf32>
    %140 = arith.subf %136, %139 : vector<8x8xf32>
    %141 = math.exp %140 : vector<8x8xf32>
    %cst_105 = arith.constant dense<0.000000e+00> : vector<8xf32>
    %142 = vector.multi_reduction <add>, %141, %cst_105 [1] : vector<8x8xf32> to vector<8xf32>
    %143 = vector.shape_cast %142 : vector<8xf32> to vector<8x1xf32>
    %144 = tpu.reciprocal %143 {approx = true} : vector<8x1xf32> -> vector<8x1xf32>
    %145 = vector.broadcast %144 : vector<8x1xf32> to vector<8x8xf32>
    %146 = arith.mulf %141, %145 : vector<8x8xf32>
    %147 = arith.truncf %146 : vector<8x8xf32> to vector<8x8xbf16>
    %148 = arith.truncf %133 : vector<8x32xf32> to vector<8x32xbf16>
    %cst_106 = arith.constant dense<0.000000e+00> : vector<8x32xf32>
    %149 = tpu.matmul %147, %148, %cst_106 {dimension_numbers = #tpu.dot_dimension_numbers<[1], [0], [0], [1], [0, 0, 1, 1], [], []>} : vector<8x8xbf16>, vector<8x32xbf16>, vector<8x32xf32> -> vector<8x32xf32>
    %150 = arith.truncf %149 : vector<8x32xf32> to vector<8x32xbf16>
    %c2_107 = arith.constant 2 : index
    %c0_108 = arith.constant 0 : index
    %c0_109 = arith.constant 0 : index
    %151 = vector.load %arg11[%c2_107, %c0_108, %c0_109] : memref<4x32x128xbf16, #tpu.memory_space<vmem>>, vector<1x32x128xbf16>
    %152 = vector.shape_cast %151 : vector<1x32x128xbf16> to vector<32x128xbf16>
    %cst_110 = arith.constant dense<0.000000e+00> : vector<8x128xf32>
    %153 = tpu.matmul %150, %152, %cst_110 {dimension_numbers = #tpu.dot_dimension_numbers<[1], [0], [0], [1], [0, 0, 1, 1], [], []>} : vector<8x32xbf16>, vector<32x128xbf16>, vector<8x128xf32> -> vector<8x128xf32>
    %154 = arith.addf %110, %153 : vector<8x128xf32>
    %c3 = arith.constant 3 : index
    %c0_111 = arith.constant 0 : index
    %c0_112 = arith.constant 0 : index
    %155 = vector.load %arg5[%c3, %c0_111, %c0_112] : memref<4x128x32xbf16, #tpu.memory_space<vmem>>, vector<1x128x32xbf16>
    %156 = vector.shape_cast %155 : vector<1x128x32xbf16> to vector<128x32xbf16>
    %cst_113 = arith.constant dense<0.000000e+00> : vector<8x32xf32>
    %157 = tpu.matmul %5, %156, %cst_113 {dimension_numbers = #tpu.dot_dimension_numbers<[1], [0], [0], [1], [0, 0, 1, 1], [], []>} : vector<8x128xbf16>, vector<128x32xbf16>, vector<8x32xf32> -> vector<8x32xf32>
    %c3_114 = arith.constant 3 : index
    %c0_115 = arith.constant 0 : index
    %c0_116 = arith.constant 0 : index
    %158 = vector.load %arg6[%c3_114, %c0_115, %c0_116] : memref<4x1x32xf32, #tpu.memory_space<vmem>>, vector<1x1x32xf32>
    %159 = vector.shape_cast %158 : vector<1x1x32xf32> to vector<1x32xf32>
    %160 = vector.broadcast %159 : vector<1x32xf32> to vector<8x32xf32>
    %161 = arith.addf %157, %160 : vector<8x32xf32>
    %cst_117 = arith.constant 0.176776692 : f32
    %162 = vector.broadcast %cst_117 : f32 to vector<8x32xf32>
    %163 = arith.mulf %161, %162 : vector<8x32xf32>
    %c3_118 = arith.constant 3 : index
    %c0_119 = arith.constant 0 : index
    %c0_120 = arith.constant 0 : index
    %164 = vector.load %arg7[%c3_118, %c0_119, %c0_120] : memref<4x128x32xbf16, #tpu.memory_space<vmem>>, vector<1x128x32xbf16>
    %165 = vector.shape_cast %164 : vector<1x128x32xbf16> to vector<128x32xbf16>
    %cst_121 = arith.constant dense<0.000000e+00> : vector<8x32xf32>
    %166 = tpu.matmul %2, %165, %cst_121 {dimension_numbers = #tpu.dot_dimension_numbers<[1], [0], [0], [1], [0, 0, 1, 1], [], []>} : vector<8x128xbf16>, vector<128x32xbf16>, vector<8x32xf32> -> vector<8x32xf32>
    %c3_122 = arith.constant 3 : index
    %c0_123 = arith.constant 0 : index
    %c0_124 = arith.constant 0 : index
    %167 = vector.load %arg8[%c3_122, %c0_123, %c0_124] : memref<4x1x32xf32, #tpu.memory_space<vmem>>, vector<1x1x32xf32>
    %168 = vector.shape_cast %167 : vector<1x1x32xf32> to vector<1x32xf32>
    %169 = vector.broadcast %168 : vector<1x32xf32> to vector<8x32xf32>
    %170 = arith.addf %166, %169 : vector<8x32xf32>
    %c3_125 = arith.constant 3 : index
    %c0_126 = arith.constant 0 : index
    %c0_127 = arith.constant 0 : index
    %171 = vector.load %arg9[%c3_125, %c0_126, %c0_127] : memref<4x128x32xbf16, #tpu.memory_space<vmem>>, vector<1x128x32xbf16>
    %172 = vector.shape_cast %171 : vector<1x128x32xbf16> to vector<128x32xbf16>
    %cst_128 = arith.constant dense<0.000000e+00> : vector<8x32xf32>
    %173 = tpu.matmul %8, %172, %cst_128 {dimension_numbers = #tpu.dot_dimension_numbers<[1], [0], [0], [1], [0, 0, 1, 1], [], []>} : vector<8x128xbf16>, vector<128x32xbf16>, vector<8x32xf32> -> vector<8x32xf32>
    %c3_129 = arith.constant 3 : index
    %c0_130 = arith.constant 0 : index
    %c0_131 = arith.constant 0 : index
    %174 = vector.load %arg10[%c3_129, %c0_130, %c0_131] : memref<4x1x32xf32, #tpu.memory_space<vmem>>, vector<1x1x32xf32>
    %175 = vector.shape_cast %174 : vector<1x1x32xf32> to vector<1x32xf32>
    %176 = vector.broadcast %175 : vector<1x32xf32> to vector<8x32xf32>
    %177 = arith.addf %173, %176 : vector<8x32xf32>
    %178 = arith.truncf %163 : vector<8x32xf32> to vector<8x32xbf16>
    %179 = arith.truncf %170 : vector<8x32xf32> to vector<8x32xbf16>
    %cst_132 = arith.constant dense<0.000000e+00> : vector<8x8xf32>
    %180 = tpu.matmul %178, %179, %cst_132 {dimension_numbers = #tpu.dot_dimension_numbers<[1], [1], [0], [0], [0, 0, 1, 0], [], []>} : vector<8x32xbf16>, vector<8x32xbf16>, vector<8x8xf32> -> vector<8x8xf32>
    %cst_133 = arith.constant dense<0xFF800000> : vector<8xf32>
    %181 = vector.multi_reduction <maximumf>, %180, %cst_133 [1] : vector<8x8xf32> to vector<8xf32>
    %182 = vector.shape_cast %181 : vector<8xf32> to vector<8x1xf32>
    %183 = vector.broadcast %182 : vector<8x1xf32> to vector<8x8xf32>
    %184 = arith.subf %180, %183 : vector<8x8xf32>
    %185 = math.exp %184 : vector<8x8xf32>
    %cst_134 = arith.constant dense<0.000000e+00> : vector<8xf32>
    %186 = vector.multi_reduction <add>, %185, %cst_134 [1] : vector<8x8xf32> to vector<8xf32>
    %187 = vector.shape_cast %186 : vector<8xf32> to vector<8x1xf32>
    %188 = tpu.reciprocal %187 {approx = true} : vector<8x1xf32> -> vector<8x1xf32>
    %189 = vector.broadcast %188 : vector<8x1xf32> to vector<8x8xf32>
    %190 = arith.mulf %185, %189 : vector<8x8xf32>
    %191 = arith.truncf %190 : vector<8x8xf32> to vector<8x8xbf16>
    %192 = arith.truncf %177 : vector<8x32xf32> to vector<8x32xbf16>
    %cst_135 = arith.constant dense<0.000000e+00> : vector<8x32xf32>
    %193 = tpu.matmul %191, %192, %cst_135 {dimension_numbers = #tpu.dot_dimension_numbers<[1], [0], [0], [1], [0, 0, 1, 1], [], []>} : vector<8x8xbf16>, vector<8x32xbf16>, vector<8x32xf32> -> vector<8x32xf32>
    %194 = arith.truncf %193 : vector<8x32xf32> to vector<8x32xbf16>
    %c3_136 = arith.constant 3 : index
    %c0_137 = arith.constant 0 : index
    %c0_138 = arith.constant 0 : index
    %195 = vector.load %arg11[%c3_136, %c0_137, %c0_138] : memref<4x32x128xbf16, #tpu.memory_space<vmem>>, vector<1x32x128xbf16>
    %196 = vector.shape_cast %195 : vector<1x32x128xbf16> to vector<32x128xbf16>
    %cst_139 = arith.constant dense<0.000000e+00> : vector<8x128xf32>
    %197 = tpu.matmul %194, %196, %cst_139 {dimension_numbers = #tpu.dot_dimension_numbers<[1], [0], [0], [1], [0, 0, 1, 1], [], []>} : vector<8x32xbf16>, vector<32x128xbf16>, vector<8x128xf32> -> vector<8x128xf32>
    %198 = arith.addf %154, %197 : vector<8x128xf32>
    %199 = arith.addf %13, %198 : vector<8x128xf32>
    %cst_140 = arith.constant dense<0.000000e+00> : vector<8xf32>
    %200 = vector.multi_reduction <add>, %199, %cst_140 [1] : vector<8x128xf32> to vector<8xf32>
    %201 = vector.shape_cast %200 : vector<8xf32> to vector<8x1xf32>
    %cst_141 = arith.constant 1.280000e+02 : f32
    %202 = vector.broadcast %cst_141 : f32 to vector<8x1xf32>
    %203 = arith.divf %201, %202 : vector<8x1xf32>
    %204 = vector.broadcast %203 : vector<8x1xf32> to vector<8x128xf32>
    %205 = arith.subf %199, %204 : vector<8x128xf32>
    %206 = arith.mulf %205, %205 : vector<8x128xf32>
    %cst_142 = arith.constant dense<0.000000e+00> : vector<8xf32>
    %207 = vector.multi_reduction <add>, %206, %cst_142 [1] : vector<8x128xf32> to vector<8xf32>
    %208 = vector.shape_cast %207 : vector<8xf32> to vector<8x1xf32>
    %cst_143 = arith.constant 1.280000e+02 : f32
    %209 = vector.broadcast %cst_143 : f32 to vector<8x1xf32>
    %210 = arith.divf %208, %209 : vector<8x1xf32>
    %211 = vector.broadcast %203 : vector<8x1xf32> to vector<8x128xf32>
    %212 = arith.subf %199, %211 : vector<8x128xf32>
    %cst_144 = arith.constant 9.99999974E-6 : f32
    %213 = vector.broadcast %cst_144 : f32 to vector<8x1xf32>
    %214 = arith.addf %210, %213 : vector<8x1xf32>
    %215 = math.rsqrt %214 : vector<8x1xf32>
    %216 = vector.broadcast %215 : vector<8x1xf32> to vector<8x128xf32>
    %217 = arith.mulf %212, %216 : vector<8x128xf32>
    %218 = vector.broadcast %15 : vector<1x128xf32> to vector<8x128xf32>
    %219 = arith.mulf %217, %218 : vector<8x128xf32>
    %220 = vector.broadcast %16 : vector<1x128xf32> to vector<8x128xf32>
    %221 = arith.addf %219, %220 : vector<8x128xf32>
    %222 = arith.truncf %221 : vector<8x128xf32> to vector<8x128xbf16>
    %c0_145 = arith.constant 0 : index
    %c0_146 = arith.constant 0 : index
    %223 = vector.load %arg15[%c0_145, %c0_146] : memref<128x512xbf16, #tpu.memory_space<vmem>>, vector<128x512xbf16>
    %cst_147 = arith.constant dense<0.000000e+00> : vector<8x512xf32>
    %224 = tpu.matmul %222, %223, %cst_147 {dimension_numbers = #tpu.dot_dimension_numbers<[1], [0], [0], [1], [0, 0, 1, 1], [], []>} : vector<8x128xbf16>, vector<128x512xbf16>, vector<8x512xf32> -> vector<8x512xf32>
    %225 = vector.broadcast %19 : vector<1x512xf32> to vector<8x512xf32>
    %226 = arith.addf %224, %225 : vector<8x512xf32>
    %cst_148 = arith.constant 0.000000e+00 : f32
    %227 = vector.broadcast %cst_148 : f32 to vector<8x512xf32>
    %228 = arith.maximumf %226, %227 : vector<8x512xf32>
    %229 = arith.truncf %228 : vector<8x512xf32> to vector<8x512xbf16>
    %c0_149 = arith.constant 0 : index
    %c0_150 = arith.constant 0 : index
    %230 = vector.load %arg17[%c0_149, %c0_150] : memref<512x128xbf16, #tpu.memory_space<vmem>>, vector<512x128xbf16>
    %cst_151 = arith.constant dense<0.000000e+00> : vector<8x128xf32>
    %231 = tpu.matmul %229, %230, %cst_151 {dimension_numbers = #tpu.dot_dimension_numbers<[1], [0], [0], [1], [0, 0, 1, 1], [], []>} : vector<8x512xbf16>, vector<512x128xbf16>, vector<8x128xf32> -> vector<8x128xf32>
    %232 = vector.broadcast %20 : vector<1x128xf32> to vector<8x128xf32>
    %233 = arith.addf %231, %232 : vector<8x128xf32>
    %234 = arith.addf %221, %233 : vector<8x128xf32>
    %cst_152 = arith.constant dense<0.000000e+00> : vector<8xf32>
    %235 = vector.multi_reduction <add>, %234, %cst_152 [1] : vector<8x128xf32> to vector<8xf32>
    %236 = vector.shape_cast %235 : vector<8xf32> to vector<8x1xf32>
    %cst_153 = arith.constant 1.280000e+02 : f32
    %237 = vector.broadcast %cst_153 : f32 to vector<8x1xf32>
    %238 = arith.divf %236, %237 : vector<8x1xf32>
    %239 = vector.broadcast %238 : vector<8x1xf32> to vector<8x128xf32>
    %240 = arith.subf %234, %239 : vector<8x128xf32>
    %241 = arith.mulf %240, %240 : vector<8x128xf32>
    %cst_154 = arith.constant dense<0.000000e+00> : vector<8xf32>
    %242 = vector.multi_reduction <add>, %241, %cst_154 [1] : vector<8x128xf32> to vector<8xf32>
    %243 = vector.shape_cast %242 : vector<8xf32> to vector<8x1xf32>
    %cst_155 = arith.constant 1.280000e+02 : f32
    %244 = vector.broadcast %cst_155 : f32 to vector<8x1xf32>
    %245 = arith.divf %243, %244 : vector<8x1xf32>
    %246 = vector.broadcast %238 : vector<8x1xf32> to vector<8x128xf32>
    %247 = arith.subf %234, %246 : vector<8x128xf32>
    %cst_156 = arith.constant 9.99999974E-6 : f32
    %248 = vector.broadcast %cst_156 : f32 to vector<8x1xf32>
    %249 = arith.addf %245, %248 : vector<8x1xf32>
    %250 = math.rsqrt %249 : vector<8x1xf32>
    %251 = vector.broadcast %250 : vector<8x1xf32> to vector<8x128xf32>
    %252 = arith.mulf %247, %251 : vector<8x128xf32>
    %253 = vector.broadcast %17 : vector<1x128xf32> to vector<8x128xf32>
    %254 = arith.mulf %252, %253 : vector<8x128xf32>
    %255 = vector.broadcast %18 : vector<1x128xf32> to vector<8x128xf32>
    %256 = arith.addf %254, %255 : vector<8x128xf32>
    %c0_157 = arith.constant 0 : index
    %c0_158 = arith.constant 0 : index
    %c0_159 = arith.constant 0 : index
    %257 = vector.load %arg21[%c0_157, %c0_158, %c0_159] : memref<1x8x128xf32, #tpu.memory_space<vmem>>, vector<1x8x128xf32>
    %258 = vector.shape_cast %257 : vector<1x8x128xf32> to vector<8x128xf32>
    %259 = vector.shape_cast %256 : vector<8x128xf32> to vector<1x8x128xf32>
    tpu.vector_store %arg21[%c0_157, %c0_158, %c0_159], %259 {strides = array<i32>} : memref<1x8x128xf32, #tpu.memory_space<vmem>>, vector<1x8x128xf32>,
    return
  }
  func.func @transform_0(%arg0: i32, %arg1: i32) -> (i32, i32, i32) {
    %c0_i32 = arith.constant 0 : i32
    %c0_i32_0 = arith.constant 0 : i32
    %c0_i32_1 = arith.constant 0 : i32
    return %arg0, %c0_i32, %c0_i32_0 : i32, i32, i32
  }
  func.func @transform_1(%arg0: i32, %arg1: i32) -> (i32, i32, i32) {
    %c0_i32 = arith.constant 0 : i32
    %c0_i32_0 = arith.constant 0 : i32
    return %arg0, %arg1, %c0_i32 : i32, i32, i32
  }
  func.func @transform_2(%arg0: i32, %arg1: i32) -> (i32, i32, i32) {
    %c0_i32 = arith.constant 0 : i32
    %c0_i32_0 = arith.constant 0 : i32
    %c0_i32_1 = arith.constant 0 : i32
    return %arg0, %c0_i32, %c0_i32_0 : i32, i32, i32
  }
  func.func @transform_3(%arg0: i32, %arg1: i32) -> (i32, i32, i32) {
    %c0_i32 = arith.constant 0 : i32
    %c0_i32_0 = arith.constant 0 : i32
    %c0_i32_1 = arith.constant 0 : i32
    %c0_i32_2 = arith.constant 0 : i32
    return %c0_i32, %c0_i32_0, %c0_i32_1 : i32, i32, i32
  }
  func.func @transform_4(%arg0: i32, %arg1: i32) -> (i32, i32, i32) {
    %c0_i32 = arith.constant 0 : i32
    %c0_i32_0 = arith.constant 0 : i32
    %c0_i32_1 = arith.constant 0 : i32
    %c0_i32_2 = arith.constant 0 : i32
    return %c0_i32, %c0_i32_0, %c0_i32_1 : i32, i32, i32
  }
  func.func @transform_5(%arg0: i32, %arg1: i32) -> (i32, i32, i32) {
    %c0_i32 = arith.constant 0 : i32
    %c0_i32_0 = arith.constant 0 : i32
    %c0_i32_1 = arith.constant 0 : i32
    %c0_i32_2 = arith.constant 0 : i32
    return %c0_i32, %c0_i32_0, %c0_i32_1 : i32, i32, i32
  }
  func.func @transform_6(%arg0: i32, %arg1: i32) -> (i32, i32, i32) {
    %c0_i32 = arith.constant 0 : i32
    %c0_i32_0 = arith.constant 0 : i32
    %c0_i32_1 = arith.constant 0 : i32
    %c0_i32_2 = arith.constant 0 : i32
    return %c0_i32, %c0_i32_0, %c0_i32_1 : i32, i32, i32
  }
  func.func @transform_7(%arg0: i32, %arg1: i32) -> (i32, i32, i32) {
    %c0_i32 = arith.constant 0 : i32
    %c0_i32_0 = arith.constant 0 : i32
    %c0_i32_1 = arith.constant 0 : i32
    %c0_i32_2 = arith.constant 0 : i32
    return %c0_i32, %c0_i32_0, %c0_i32_1 : i32, i32, i32
  }
  func.func @transform_8(%arg0: i32, %arg1: i32) -> (i32, i32, i32) {
    %c0_i32 = arith.constant 0 : i32
    %c0_i32_0 = arith.constant 0 : i32
    %c0_i32_1 = arith.constant 0 : i32
    %c0_i32_2 = arith.constant 0 : i32
    return %c0_i32, %c0_i32_0, %c0_i32_1 : i32, i32, i32
  }
  func.func @transform_9(%arg0: i32, %arg1: i32) -> (i32, i32, i32) {
    %c0_i32 = arith.constant 0 : i32
    %c0_i32_0 = arith.constant 0 : i32
    %c0_i32_1 = arith.constant 0 : i32
    %c0_i32_2 = arith.constant 0 : i32
    return %c0_i32, %c0_i32_0, %c0_i32_1 : i32, i32, i32
  }
  func.func @transform_10(%arg0: i32, %arg1: i32) -> (i32, i32) {
    %c0_i32 = arith.constant 0 : i32
    %c0_i32_0 = arith.constant 0 : i32
    %c0_i32_1 = arith.constant 0 : i32
    return %c0_i32, %c0_i32_0 : i32, i32
  }
  func.func @transform_11(%arg0: i32, %arg1: i32) -> (i32, i32) {
    %c0_i32 = arith.constant 0 : i32
    %c0_i32_0 = arith.constant 0 : i32
    %c0_i32_1 = arith.constant 0 : i32
    return %c0_i32, %c0_i32_0 : i32, i32
  }
  func.func @transform_12(%arg0: i32, %arg1: i32) -> (i32, i32) {
    %c0_i32 = arith.constant 0 : i32
    %c0_i32_0 = arith.constant 0 : i32
    %c0_i32_1 = arith.constant 0 : i32
    return %c0_i32, %c0_i32_0 : i32, i32
  }
  func.func @transform_13(%arg0: i32, %arg1: i32) -> (i32, i32) {
    %c0_i32 = arith.constant 0 : i32
    %c0_i32_0 = arith.constant 0 : i32
    %c0_i32_1 = arith.constant 0 : i32
    return %c0_i32, %c0_i32_0 : i32, i32
  }
  func.func @transform_14(%arg0: i32, %arg1: i32) -> (i32, i32) {
    %c0_i32 = arith.constant 0 : i32
    %c0_i32_0 = arith.constant 0 : i32
    %c0_i32_1 = arith.constant 0 : i32
    return %c0_i32, %c0_i32_0 : i32, i32
  }
  func.func @transform_15(%arg0: i32, %arg1: i32) -> (i32, i32) {
    %c0_i32 = arith.constant 0 : i32
    %c0_i32_0 = arith.constant 0 : i32
    %c0_i32_1 = arith.constant 0 : i32
    return %c0_i32, %c0_i32_0 : i32, i32
  }
  func.func @transform_16(%arg0: i32, %arg1: i32) -> (i32, i32) {
    %c0_i32 = arith.constant 0 : i32
    %c0_i32_0 = arith.constant 0 : i32
    %c0_i32_1 = arith.constant 0 : i32
    return %c0_i32, %c0_i32_0 : i32, i32
  }
  func.func @transform_17(%arg0: i32, %arg1: i32) -> (i32, i32) {
    %c0_i32 = arith.constant 0 : i32
    %c0_i32_0 = arith.constant 0 : i32
    %c0_i32_1 = arith.constant 0 : i32
    return %c0_i32, %c0_i32_0 : i32, i32
  }
  func.func @transform_18(%arg0: i32, %arg1: i32) -> (i32, i32) {
    %c0_i32 = arith.constant 0 : i32
    %c0_i32_0 = arith.constant 0 : i32
    %c0_i32_1 = arith.constant 0 : i32
    return %c0_i32, %c0_i32_0 : i32, i32
  }
  func.func @transform_19(%arg0: i32, %arg1: i32) -> (i32, i32, i32) {
    %c0_i32 = arith.constant 0 : i32
    %c0_i32_0 = arith.constant 0 : i32
    return %arg0, %arg1, %c0_i32 : i32, i32, i32
  }
}

</mosaic_0001>

<bundles_post_ra>
// kernel: tpu_custom_call.1
= control target key start
LH: loop header
LB: loop body
LE: loop exit
PB: predicated region body
PF: predicated region fallthrough
CT: control target
= control target key end

     0   :  { %s4923_s0 = inlined_call_operand.vmem [shape: f32[2,8,128], index: 0, kind: input, shape index: {}]   ;;  %s4924_s1 = inlined_call_operand.vmem [shape: f32[2,8,128], index: 1, kind: input, shape index: {}]   ;;  %s4925_s2 = inlined_call_operand.vmem [shape: f32[2,8,128], index: 2, kind: input, shape index: {}]   ;;  %s4926_s3 = inlined_call_operand.vmem [shape: bf16[4,128,32], index: 3, kind: input, shape index: {}]   ;;  %s4927_s4 = inlined_call_operand.vmem [shape: f32[4,1,32], index: 4, kind: input, shape index: {}]   ;;  %s4928_s5 = inlined_call_operand.vmem [shape: bf16[4,128,32], index: 5, kind: input, shape index: {}]   ;;  %s4929_s6 = inlined_call_operand.vmem [shape: f32[4,1,32], index: 6, kind: input, shape index: {}]   ;;  %s4930_s7 = inlined_call_operand.vmem [shape: bf16[4,128,32], index: 7, kind: input, shape index: {}]   ;;  %s4931_s8 = inlined_call_operand.vmem [shape: f32[4,1,32], index: 8, kind: input, shape index: {}]   ;;  %s4932_s9 = inlined_call_operand.vmem [shape: bf16[4,32,128], index: 9, kind: input, shape index: {}]   ;;  %s4933_s10 = inlined_call_operand.vmem [shape: f32[1,128], index: 10, kind: input, shape index: {}]   ;;  %s4934_s11 = inlined_call_operand.vmem [shape: f32[1,128], index: 11, kind: input, shape index: {}]   ;;  %s4935_s12 = inlined_call_operand.vmem [shape: f32[1,128], index: 12, kind: input, shape index: {}]   ;;  %s4936_s13 = inlined_call_operand.vmem [shape: bf16[128,512], index: 13, kind: input, shape index: {}]   ;;  %s4937_s14 = inlined_call_operand.vmem [shape: f32[1,512], index: 14, kind: input, shape index: {}]   ;;  %s4938_s15 = inlined_call_operand.vmem [shape: bf16[512,128], index: 15, kind: input, shape index: {}]   ;;  %s4939_s16 = inlined_call_operand.vmem [shape: f32[1,128], index: 16, kind: input, shape index: {}]   ;;  %s4940_s17 = inlined_call_operand.vmem [shape: f32[1,128], index: 17, kind: input, shape index: {}]   ;;  %s4941_s18 = inlined_call_operand.vmem [shape: f32[1,128], index: 18, kind: input, shape index: {}]   ;;  %s4942_s19 = inlined_call_operand.hbm [shape: f32[2,8,128], index: 19, kind: output, shape index: {}]  }
   0x1   :  { %4954 = sst [smem:[#allocation13_spill]] %s4923_s0 }
   0x2   :  { %4955 = sst [smem:[#allocation14_spill]] %s4924_s1 }
   0x3   :  { %4956 = sst [smem:[#allocation15_spill]] %s4925_s2 }
   0x4   :  { %4957 = sst [smem:[#allocation16_spill]] %s4926_s3 }
   0x5   :  { %4958 = sst [smem:[#allocation17_spill]] %s4927_s4 }
   0x6   :  { %4959 = sst [smem:[#allocation18_spill]] %s4940_s17 }
   0x7   :  { %4960 = sst [smem:[#allocation19_spill]] %s4941_s18 }
   0x8   :  { %4961 = sst [smem:[#allocation20_spill]] %s4942_s19 }
   0x9   :  { %24 = vsyncpa [#allocation3], 0 }
   0xa   :  { %26 = vsyncpa [#allocation3 + $0x1], 0  ;;  %s4085_s0 = smov 0   ;;  %s4087_s30 = smov 0  }
   0xb   :  { %s4089_s20 = smov 0   ;;  %s4091_s21 = smov 0  }
   0xc   :  { %s4093_s1 = smov 0   ;;  %s4095_s22 = smov 0  }
   0xd LB: > { %4962 = sst [smem:[#allocation5_spill]] %s3962_s0  ;;  %s2778_s2 = sadd.s32 4294967295, %s3982_s22   ;;  %s3982_s22 = sphi %s4095_s22, %s32_s22   ;;  %s3978_s1 = sphi %s4093_s1, %s4988_s1   ;;  %s3974_s21 = sphi %s4091_s21, %s4987_s21   ;;  %s3970_s20 = sphi %s4089_s20, %s4986_s20   ;;  %s3966_s30 = sphi %s4087_s30, %s4990_s30   ;;  %s3962_s0 = sphi %s4085_s0, %s4989_s0  }
   0xe   : > { %4963 = sst [smem:[#allocation6_spill]] %s3970_s20  ;;  %s2779_s23 = sadd.s32 4294967294, %s3982_s22  }
   0xf   : > { %4964 = sst [smem:[#allocation7_spill]] %s3978_s1  ;;  %s44_s24 = sadd.s32 1, %s3978_s1 }
  0x10   : > { %4965 = sst [smem:[#allocation8_spill]] %s3982_s22  ;;  %s469_s25 = sadd.s32 1, %s3970_s20 }
  0x11   : > { %p46_p0 = scmp.ge.s32.totalorder %s44_s24, 2  ;;  %p479_p1 = scmp.ne.s32.totalorder %s3970_s20, %s3966_s30 }
  0x12   : > { %p480_p2 = scmp.eq.s32.totalorder %s2778_s2, 1  ;;  %p485_p3 = scmp.ne.s32.totalorder %s3966_s30, %s3962_s0 }
  0x13   : > { %s4992_s24 = smov (%p46_p0, %s44_s24), 0  ;;  %p486_p5 = scmp.eq.s32.totalorder %s2779_s23, 1 }
  0x14   : > { %4966 = sst [smem:[#allocation9_spill]] %s4992_s24  ;;  %p4125_p4 = por %p480_p2, %p479_p1 }
  0x15   : > { %s464_s26 = ssub.s32 %s3978_s1, %s4992_s24  ;;  %p2782_p6 = scmp.ge.s32.totalorder %s3982_s22, 1 }
  0x16   : > { %s4967_s3 = scalar_select %p4125_p4, 1, 0 }
  0x17   : > { %p467_p7 = scmp.eq.s32.totalorder %s464_s26, 0  ;;  %p4132_p8 = por %p486_p5, %p485_p3 }
  0x18   : > { %4968 = sst [smem:[#allocation10_spill]] %s4967_s3  ;;  %p576_p9 = scmp.lt.s32.totalorder %s3982_s22, 3 }
  0x19   : > { %s4969_s27 = scalar_select %p4132_p8, 1, 0 }
  0x1a   : > { %s4138_s28 = scalar_select %p467_p7, %s3970_s20, %s469_s25  }
  0x1b   : > { %4970 = sst [smem:[#allocation11_spill]] %s4969_s27  ;;  %p577_p10 = pnand %p2782_p6, %p576_p9 }
  0x1c   : > { %4971 = sst [smem:[#allocation12_spill]] %s4138_s28  ;;  %p642_p11 = scmp.lt.s32.totalorder (!%p577_p10), %s3974_s21, 1 }
  0x1d   : > { %580 = sbr.rel (%p577_p10) target bundleno = 3269 (0xcc5), region = 96  ;;  %s4972_s0 = sld [smem:[#allocation16_spill]] (!%p577_p10) }
  0x1e   : > { %s4974_s28 = sld [smem:[#allocation14_spill]] (!%p577_p10) }
  0x1f   : > { %s4976_s4 = sld [smem:[#allocation17_spill]] (!%p577_p10) }
  0x20   : > { %s4977_s2 = sld [smem:[#allocation15_spill]] (!%p577_p10) }
  0x21   : > { %s4981_s17 = sld [smem:[#allocation19_spill]] (!%p577_p10) }
  0x22   : > { %v3655_v1 = vld [vmem:[%s4928_s5 + $0x38] sm:$0xff]  ;;  %v3654_v3 = vld [vmem:[%s4928_s5 + $0x30] sm:$0xff]  ;;  %v3653_v5 = vld [vmem:[%s4928_s5 + $0x28] sm:$0xff]  ;;  %vm923_vm0 = vcmask 261120   ;;  %vm943_vm1 = vcmask 64512   ;;  %vm960_vm2 = vcmask 1043456  }
  0x23   : > { %s4973_s18 = smov %s4972_s0  ;;  %v3647_v0 = vld [vmem:[%s4972_s0 + $0x38] sm:$0xff]  ;;  %827 = vmatpush.bf16.msra.mxu1 %v3655_v1  ;;  %v3652_v7 = vld [vmem:[%s4928_s5 + $0x20] sm:$0xff]  ;;  %v3650_v11 = vld [vmem:[%s4928_s5 + $0x10] sm:$0xff] }
  0x24   : > { %745 = vmatpush.bf16.msra.mxu0 %v3647_v0  ;;  %v3646_v2 = vld [vmem:[%s4973_s18 + $0x30] sm:$0xff]  ;;  %v3645_v4 = vld [vmem:[%s4973_s18 + $0x28] sm:$0xff]  ;;  %v3644_v6 = vld [vmem:[%s4973_s18 + $0x20] sm:$0xff]  ;;  %s643_s0 = scalar_select %p642_p11, %s3974_s21, 1 }
  0x25   : > { %v3643_v8 = vld [vmem:[%s4973_s18 + $0x18] sm:$0xff]  ;;  %v3642_v10 = vld [vmem:[%s4973_s18 + $0x10] sm:$0xff]  ;;  %v3641_v12 = vld [vmem:[%s4973_s18 + $0x8] sm:$0xff] }
  0x26   : > { %v3651_v9 = vld [vmem:[%s4928_s5 + $0x18] sm:$0xff]  ;;  %s4178_s26 = sshll.u32 %s643_s0, 3  ;;  %v3649_v13 = vld [vmem:[%s4928_s5 + $0x8] sm:$0xff]  ;;  %s4975_s0 = sld [smem:[#allocation13_spill]]  ;;  %v3640_v14 = vld [vmem:[%s4973_s18] sm:$0xff] }
  0x27   : > { %828 = vmatpush.bf16.msra.mxu1 %v3654_v3  ;;  %s652_s20 = scalar_lea.vmem %s4974_s28, %s4178_s26  ;;  %v3648_v15 = vld [vmem:[%s4928_s5] sm:$0xff]  ;;  %v3663_v32 = vld [vmem:[%s4930_s7 + $0x38] sm:$0xff]  ;;  %v3662_v33 = vld [vmem:[%s4930_s7 + $0x30] sm:$0xff]  ;;  %s656_s1 = scalar_lea.vmem %s4977_s2, %s4178_s26 }
  0x28   : > { %746 = vmatpush.bf16.msra.mxu0 %v3646_v2  ;;  %v660_v16 = vld [vmem:[%s652_s20] sm:$0xff]  ;;  %908 = vmatpush.bf16.msra.mxu2 %v3663_v32  ;;  %v3661_v34 = vld [vmem:[%s4930_s7 + $0x28] sm:$0xff]  ;;  %v3659_v36 = vld [vmem:[%s4930_s7 + $0x18] sm:$0xff]  ;;  %s639_s28 = sand.u32 1, %s3966_s30   ;;  %s3637_s20 = sshll.u32 %s3974_s21, 3 }
  0x29   : > { %v4200_v18 = vpack.c.bf16 %v660_v16, %v660_v16  ;;  %v3864_v20 = vld [vmem:[%s4976_s4] ss:$0 sm:$0xff]  ;;  %v3658_v37 = vld [vmem:[%s4930_s7 + $0x10] sm:$0xff]  ;;  %v3657_v38 = vld [vmem:[%s4930_s7 + $0x8] sm:$0xff]  ;;  %s2783_s29 = sshll.u32 %s639_s28, 3 }
  0x2a   : > { %v3865_v21 = vld [vmem:[%s4929_s6] ss:$0 sm:$0xff]  ;;  %v3681_v45 = vld [vmem:[%s4928_s5 + $0x78] sm:$0xff]  ;;  %v3680_v46 = vld [vmem:[%s4928_s5 + $0x70] sm:$0xff]  ;;  %s641_s22 = scalar_lea.vmem [#allocation2], %s2783_s29 }
  0x2b   : > { %829 = vmatpush.bf16.msra.mxu1 %v3653_v5  ;;  %v3660_v35 = vld [vmem:[%s4930_s7 + $0x20] sm:$0xff]  ;;  %v3679_v47 = vld [vmem:[%s4928_s5 + $0x68] sm:$0xff]  ;;  %v3673_v49 = vld [vmem:[%s4973_s18 + $0x78] sm:$0xff]  ;;  %s2678_s21 = sshll.u32 %s641_s22, 4  ;;  %s2679_s21 = int_to_ptr.vmem [resolvable:$true] %s2678_s21 }
  0x2c   : > { %747 = vmatpush.bf16.msra.mxu0 %v3645_v4  ;;  %s645_s27 = scalar_lea.vmem %s4975_s0, %s4178_s26  ;;  %909 = vmatpush.bf16.msra.mxu2 %v3662_v33  ;;  %v3656_v41 = vld [vmem:[%s4930_s7] sm:$0xff]  ;;  %v3677_v51 = vld [vmem:[%s4928_s5 + $0x58] sm:$0xff]  ;;  %v3672_v53 = vld [vmem:[%s4973_s18 + $0x70] sm:$0xff]  ;;  %s4979_s26 = sld [smem:[#allocation20_spill]] }
  0x2d   : > { %v658_v17 = vld [vmem:[%s645_s27] sm:$0xff]  ;;  %v3676_v55 = vld [vmem:[%s4928_s5 + $0x50] sm:$0xff]  ;;  %v3671_v56 = vld [vmem:[%s4973_s18 + $0x68] sm:$0xff]  ;;  %s2665_s27 = scalar_lea.sflag [#allocation3], %s639_s28 }
  0x2e   : > { %v4202_v19 = vpack.c.bf16 %v658_v17, %v658_v17  ;;  %v4243_v42 = vld [vmem:[%s656_s1] sm:$0xff]  ;;  %v3675_v57 = vld [vmem:[%s4928_s5 + $0x48] sm:$0xff]  ;;  %v3669_v3 = vld [vmem:[%s4973_s18 + $0x58] sm:$0xff]  ;;  %s4978_s1 = sld [smem:[#allocation18_spill]] }
  0x2f   : > { %830 = vmatpush.bf16.msra.mxu1 %v3652_v7  ;;  %v4247_v43 = vpack.c.bf16 %v4243_v42, %v4243_v42  ;;  %v3678_v48 = vld [vmem:[%s4928_s5 + $0x60] sm:$0xff]  ;;  %v3668_v5 = vld [vmem:[%s4973_s18 + $0x50] sm:$0xff]  ;;  %v3665_v7 = vld [vmem:[%s4932_s9 + $0x8] sm:$0xff] }
  0x30   : > { %748 = vmatpush.bf16.msra.mxu0 %v3644_v6  ;;  %910 = vmatpush.bf16.msra.mxu2 %v3661_v34  ;;  %v3866_v60 = vld [vmem:[%s4931_s8] ss:$0 sm:$0xff]  ;;  %v3667_v6 = vld [vmem:[%s4973_s18 + $0x48] sm:$0xff]  ;;  %v3688_v32 = vld [vmem:[%s4930_s7 + $0x70] sm:$0xff] }
  0x31   : > { %v3670_v2 = vld [vmem:[%s4973_s18 + $0x60] sm:$0xff]  ;;  %v3687_v33 = vld [vmem:[%s4930_s7 + $0x68] sm:$0xff] }
  0x32   : > { %v3674_v4 = vld [vmem:[%s4928_s5 + $0x40] sm:$0xff]  ;;  %s2676_s23 = scalar_lea.hbm %s4979_s26, %s3637_s20  ;;  %s3924_s3 = scalar_lea.hbm %s4979_s26, 16 }
  0x33   : > { %831 = vmatpush.bf16.msra.mxu1 %v3651_v9 }
  0x34   : > { %749 = vmatpush.bf16.msra.mxu0 %v3643_v8  ;;  %911 = vmatpush.bf16.msra.mxu2 %v3660_v35  ;;  %v3666_v8 = vld [vmem:[%s4973_s18 + $0x40] sm:$0xff] }
  0x35   : > { %v3686_v35 = vld [vmem:[%s4930_s7 + $0x60] sm:$0xff] }
  0x37   : > { %832 = vmatpush.bf16.msra.mxu1 %v3650_v11 }
  0x38   : > { %750 = vmatpush.bf16.msra.mxu0 %v3642_v10  ;;  %912 = vmatpush.bf16.msra.mxu2 %v3659_v36  ;;  %v3685_v36 = vld [vmem:[%s4930_s7 + $0x58] sm:$0xff] }
  0x3b   : > { %833 = vmatpush.bf16.msra.mxu1 %v3649_v13  ;;  %v3664_v13 = vld [vmem:[%s4932_s9] sm:$0xff] }
  0x3c   : > { %751 = vmatpush.bf16.msra.mxu0 %v3641_v12  ;;  %913 = vmatpush.bf16.msra.mxu2 %v3658_v37 }
  0x3f   : > { %834 = vmatpush.bf16.msra.mxu1 %v3648_v15 }
  0x40   : > { %752 = vmatpush.bf16.msra.mxu0 %v3640_v14  ;;  %914 = vmatpush.bf16.msra.mxu2 %v3657_v38  ;;  %v3867_v14 = vld [vmem:[%s4929_s6 + $0x1] ss:$0 sm:$0xff]  ;;  %v3684_v38 = vld [vmem:[%s4930_s7 + $0x50] sm:$0xff] }
  0x42   : > { %835 = vmatmul.bf16.vlgmr.msra.gmra.mxu1 %v4202_v19 }
  0x43   : > { %753 = vmatmul.bf16.vlgmr.msra.gmra.mxu0 %v4200_v18  ;;  %1165 = vmatpush.bf16.msrb.mxu1 %v3681_v45 }
  0x44   : > { %915 = vmatpush.bf16.msra.mxu2 %v3656_v41  ;;  %1081 = vmatpush.bf16.msrb.mxu0 %v3673_v49  ;;  %v3704_v49 = vld [vmem:[%s4928_s5 + $0xa0] sm:$0xff] }
  0x47   : > { %916 = vmatmul.bf16.vlgmr.msra.gmra.mxu2 %v4247_v43  ;;  %1166 = vmatpush.bf16.msrb.mxu1 %v3680_v46  ;;  %v3707_v46 = vld [vmem:[%s4928_s5 + $0xb8] sm:$0xff] }
  0x48   : > { %1082 = vmatpush.bf16.msrb.mxu0 %v3672_v53 }
  0x4b   : > { %1167 = vmatpush.bf16.msrb.mxu1 %v3679_v47  ;;  %v3706_v47 = vld [vmem:[%s4928_s5 + $0xb0] sm:$0xff] }
  0x4c   : > { %1083 = vmatpush.bf16.msrb.mxu0 %v3671_v56 }
  0x4f   : > { %1168 = vmatpush.bf16.msrb.mxu1 %v3678_v48  ;;  %v3705_v48 = vld [vmem:[%s4928_s5 + $0xa8] sm:$0xff] }
  0x50   : > { %1084 = vmatpush.bf16.msrb.mxu0 %v3670_v2 }
  0x53   : > { %1169 = vmatpush.bf16.msrb.mxu1 %v3677_v51  ;;  %v3699_v51 = vld [vmem:[%s4973_s18 + $0xb8] sm:$0xff] }
  0x54   : > { %1085 = vmatpush.bf16.msrb.mxu0 %v3669_v3 }
  0x57   : > { %1170 = vmatpush.bf16.msrb.mxu1 %v3676_v55  ;;  %v3702_v55 = vld [vmem:[%s4928_s5 + $0x90] sm:$0xff] }
  0x58   : > { %1086 = vmatpush.bf16.msrb.mxu0 %v3668_v5  ;;  %v3695_v5 = vld [vmem:[%s4973_s18 + $0x98] sm:$0xff] }
  0x5b   : > { %1171 = vmatpush.bf16.msrb.mxu1 %v3675_v57  ;;  %v3697_v57 = vld [vmem:[%s4973_s18 + $0xa8] sm:$0xff] }
  0x5c   : > { %1087 = vmatpush.bf16.msrb.mxu0 %v3667_v6  ;;  %v3694_v6 = vld [vmem:[%s4973_s18 + $0x90] sm:$0xff] }
  0x5f   : > { %1172 = vmatpush.bf16.msrb.mxu1 %v3674_v4  ;;  %v3696_v4 = vld [vmem:[%s4973_s18 + $0xa0] sm:$0xff] }
  0x60   : > { %1088 = vmatpush.bf16.msrb.mxu0 %v3666_v8  ;;  %v3691_v8 = vld [vmem:[%s4932_s9 + $0x18] sm:$0xff] }
  0x62   : > { %1173 = vmatmul.bf16.vlgmr.msrb.gmra.mxu1 %v4202_v19 }
  0x63   : > { %1089 = vmatmul.bf16.vlgmr.msrb.gmra.mxu0 %v4200_v18  ;;  %1419 = vmatpush.bf16.msra.mxu1 %v3699_v51  ;;  %v3725_v51 = vld [vmem:[%s4973_s18 + $0xf8] sm:$0xff] }
  0x64   : > { %1341 = vmatpush.bf16.msra.mxu0 %v3691_v8 }
  0xbf   : > { %v836_v23 = vpop.f32.mrf.mxu1 }
  0xc0   : > { %v754_v22 = vpop.f32.mrf.mxu0  ;;  %v837_v25 = vadd.f32 %v3865_v21, %v836_v23 }
  0xc1   : > { %v755_v24 = vadd.f32 %v3864_v20, %v754_v22 }
  0xc2   : > { %v922_v26 = vpack.c.bf16 %v837_v25, %v837_v25 }
  0xc3   : > { %v758_v27 = vmul.f32 0.17677669, %v755_v24 }
  0xc4   : > { %v928_v28 = vsel %vm923_vm0, %v922_v26, 0  ;;  %v3868_v26 = vld [vmem:[%s4976_s4 + $0x1] ss:$0 sm:$0xff] }
  0xc5   : > { %937 = vmatpush.bf16.xpose.msra.mxu3 %v928_v28  ;;  %v921_v31 = vpack.c.bf16 %v758_v27, %v758_v27 }
  0xc7   : > { %v838_v30 = vpop.f32.mrf.mxu1 }
  0xc8   : > { %v756_v29 = vpop.f32.mrf.mxu0 }
  0xca   : > { %v917_v61 = vpop.f32.mrf.mxu2 }
  0xcb   : > { %v918_v62 = vadd.f32 %v3866_v60, %v917_v61 }
  0xcc   : > { %2883 = vmatmul.msk.bf16.vlgmr.msra.gmra.mxu3 %vm923_vm0, %v921_v31  ;;  %v3689_v31 = vld [vmem:[%s4930_s7 + $0x78] sm:$0xff] }
  0xcd   : > { %v956_v63 = vpack.c.bf16 %v918_v62, %v918_v62  ;;  %1248 = vmatpush.bf16.msrb.mxu2 %v3689_v31  ;;  %v3870_v62 = vld [vmem:[%s4931_s8 + $0x1] ss:$0 sm:$0xff] }
  0xcf   : > { %v962_v0 = vsel %vm960_vm2, %v956_v63, 0 }
  0xd0   : > { %971 = vmatpush.bf16.msrb.mxu3 %v962_v0 }
  0xd1   : > { %1249 = vmatpush.bf16.msrb.mxu2 %v3688_v32  ;;  %v3715_v32 = vld [vmem:[%s4930_s7 + $0xb8] sm:$0xff] }
  0xd2   : > { %v919_v1 = vpop.f32.mrf.mxu2 }
  0xd4   : > { %1003 = vmatpush.bf16.msra.mxu3 %v3665_v7  ;;  %v3693_v7 = vld [vmem:[%s4973_s18 + $0x88] sm:$0xff] }
  0xd5   : > { %1250 = vmatpush.bf16.msrb.mxu2 %v3687_v33  ;;  %v3714_v33 = vld [vmem:[%s4930_s7 + $0xb0] sm:$0xff] }
  0xd8   : > { %1004 = vmatpush.bf16.msra.mxu3 %v3664_v13 }
  0xd9   : > { %1251 = vmatpush.bf16.msrb.mxu2 %v3686_v35  ;;  %v3869_v35 = vld [vmem:[%s4933_s10] ss:$0 sm:$0xff] }
  0xdd   : > { %1252 = vmatpush.bf16.msrb.mxu2 %v3685_v36  ;;  %v3713_v36 = vld [vmem:[%s4930_s7 + $0xa8] sm:$0xff] }
  0xdf   : > { %v1174_v15 = vpop.f32.mrf.mxu1 }
  0xe0   : > { %v1175_v16 = vadd.f32 %v3867_v14, %v1174_v15  ;;  %v1090_v22 = vpop.f32.mrf.mxu0  ;;  %v3871_v15 = vld [vmem:[%s4929_s6 + $0x2] ss:$0 sm:$0xff] }
  0xe1   : > { %v1091_v27 = vadd.f32 %v3868_v26, %v1090_v22  ;;  %1253 = vmatpush.bf16.msrb.mxu2 %v3684_v38 }
  0xe2   : > { %v1262_v17 = vpack.c.bf16 %v1175_v16, %v1175_v16 }
  0xe3   : > { %v1094_v29 = vmul.f32 0.17677669, %v1091_v27  ;;  %v3872_v27 = vld [vmem:[%s4976_s4 + $0x2] ss:$0 sm:$0xff] }
  0xe4   : > { %v1267_v20 = vsel %vm923_vm0, %v1262_v17, 0 }
  0xe5   : > { %v1261_v30 = vpack.c.bf16 %v1094_v29, %v1094_v29 }
  0xe7   : > { %v1176_v21 = vpop.f32.mrf.mxu1 }
  0xe8   : > { %v1092_v23 = vpop.f32.mrf.mxu0 }
 0x14f   : > { %v939_v39 = vpop.f32.mrf.mxu3 }
 0x150   : > { %v944_v40 = vsel %vm943_vm1, %v939_v39, -inf }
 0x151   : > { %945 = vmax.xlane.f32.xlu0 %v944_v40 }
 0x157   : > { %v941_v44 = vpop.f32.mrf.mxu3 }
 0x158   : > { %v3682_v44 = vld [vmem:[%s4930_s7 + $0x40] sm:$0xff] }
 0x1c4   : > { %v946_v50 = vpop.xlane.xlu0 %945 }
 0x1c5   : > { %v947_v52 = vsub.f32 %v939_v39, %v946_v50  ;;  %v3683_v39 = vld [vmem:[%s4930_s7 + $0x48] sm:$0xff]  ;;  %v3703_v50 = vld [vmem:[%s4928_s5 + $0x98] sm:$0xff] }
 0x1c6   : > { %1254 = vmatpush.bf16.msrb.mxu2 %v3683_v39 }
 0x1c7   : > { %v948_v54 = vmul.f32 1.442695, %v947_v52 }
 0x1c9   : > { %3882 = vpow2.f32 %v948_v54  ;;  %v3698_v54 = vld [vmem:[%s4973_s18 + $0xb0] sm:$0xff] }
 0x1ca   : > { %1255 = vmatpush.bf16.msrb.mxu2 %v3682_v44  ;;  %1420 = vmatpush.bf16.msra.mxu1 %v3698_v54  ;;  %v3730_v54 = vld [vmem:[%s4928_s5 + $0xe0] sm:$0xff] }
 0x1cd   : > { %1256 = vmatmul.bf16.vlgmr.msrb.gmra.mxu2 %v4247_v43 }
 0x1ce   : > { %1503 = vmatpush.bf16.msra.mxu2 %v3707_v46  ;;  %1421 = vmatpush.bf16.msra.mxu1 %v3697_v57  ;;  %v3723_v57 = vld [vmem:[%s4973_s18 + $0xe8] sm:$0xff] }
 0x1cf   : > { %v3883_v58 = vpop.eup %3882 }
 0x1d0   : > { %v950_v59 = vsel %vm943_vm1, %v3883_v58, 0.0 }
 0x1d1   : > { %951 = vadd.xlane.f32.xlu0 %v950_v59  ;;  %v3700_v59 = vld [vmem:[%s4928_s5 + $0x80] sm:$0xff] }
 0x1d2   : > { %1504 = vmatpush.bf16.msra.mxu2 %v3706_v47  ;;  %1422 = vmatpush.bf16.msra.mxu1 %v3696_v4 }
 0x1d6   : > { %1505 = vmatpush.bf16.msra.mxu2 %v3705_v48  ;;  %1423 = vmatpush.bf16.msra.mxu1 %v3695_v5  ;;  %v3708_v48 = vld [vmem:[%s4930_s7 + $0x80] sm:$0xff] }
 0x1d7   : > { %v3873_v5 = vld [vmem:[%s4931_s8 + $0x2] ss:$0 sm:$0xff] }
 0x1da   : > { %1506 = vmatpush.bf16.msra.mxu2 %v3704_v49  ;;  %1424 = vmatpush.bf16.msra.mxu1 %v3694_v6 }
 0x1de   : > { %1507 = vmatpush.bf16.msra.mxu2 %v3703_v50  ;;  %1425 = vmatpush.bf16.msra.mxu1 %v3693_v7  ;;  %v3733_v50 = vld [vmem:[%s4928_s5 + $0xf8] sm:$0xff] }
 0x1e2   : > { %1508 = vmatpush.bf16.msra.mxu2 %v3702_v55  ;;  %v3729_v55 = vld [vmem:[%s4928_s5 + $0xd8] sm:$0xff] }
 0x244   : > { %v952_v9 = vpop.xlane.xlu0 %951 }
 0x245   : > { %3884 = vrcp.f32 %v952_v9  ;;  %v3692_v9 = vld [vmem:[%s4973_s18 + $0x80] sm:$0xff] }
 0x246   : > { %1426 = vmatpush.bf16.msra.mxu1 %v3692_v9 }
 0x249   : > { %1427 = vmatmul.bf16.vlgmr.msra.gmra.mxu1 %v4200_v18 }
 0x24b   : > { %v3885_v10 = vpop.eup %3884 }
 0x24c   : > { %v954_v11 = vmul.f32 %v3885_v10, %v3883_v58  ;;  %v3701_v58 = vld [vmem:[%s4928_s5 + $0x88] sm:$0xff]  ;;  %v3690_v10 = vld [vmem:[%s4932_s9 + $0x10] sm:$0xff] }
 0x24d   : > { %1509 = vmatpush.bf16.msra.mxu2 %v3701_v58  ;;  %1342 = vmatpush.bf16.msra.mxu0 %v3690_v10  ;;  %v3728_v58 = vld [vmem:[%s4928_s5 + $0xd0] sm:$0xff] }
 0x24e   : > { %v955_v12 = vpack.c.bf16 %v954_v11, %v954_v11 }
 0x250   : > { %2884 = vmatmul.msk.bf16.vlgmr.msrb.gmra.mxu3 %vm943_vm1, %v955_v12  ;;  %v1257_v63 = vpop.f32.mrf.mxu2 }
 0x251   : > { %1276 = vmatpush.bf16.xpose.msrb.mxu3 %v1267_v20  ;;  %1510 = vmatpush.bf16.msra.mxu2 %v3700_v59  ;;  %v1258_v0 = vadd.f32 %v3870_v62, %v1257_v63  ;;  %v3727_v63 = vld [vmem:[%s4928_s5 + $0xc8] sm:$0xff] }
 0x253   : > { %v1294_v1 = vpack.c.bf16 %v1258_v0, %v1258_v0  ;;  %v3721_v0 = vld [vmem:[%s4973_s18 + $0xd8] sm:$0xff] }
 0x254   : > { %1511 = vmatmul.bf16.vlgmr.msra.gmra.mxu2 %v4202_v19 }
 0x255   : > { %v1299_v2 = vsel %vm960_vm2, %v1294_v1, 0  ;;  %1757 = vmatpush.bf16.msrb.mxu2 %v3725_v51  ;;  %v3726_v1 = vld [vmem:[%s4928_s5 + $0xc0] sm:$0xff] }
 0x258   : > { %v1259_v3 = vpop.f32.mrf.mxu2 }
 0x2c6   : > { %v1428_v23 = vpop.f32.mrf.mxu1 }
 0x2d3   : > { %v973_v24 = vpop.f32.mrf.mxu3 }
 0x2d4   : > { %v977_v25 = vpack.c.bf16 %v973_v24, %v973_v24  ;;  %v1430_v24 = vpop.f32.mrf.mxu1 }
 0x2d6   : > { %2893 = vmatmul.msk.bf16.vlgmr.msra.gmra.mxu3 %vm923_vm0, %v977_v25 }
 0x2d7   : > { %1308 = vmatpush.bf16.msra.mxu3 %v1299_v2  ;;  %v1512_v16 = vpop.f32.mrf.mxu2  ;;  %v3720_v2 = vld [vmem:[%s4973_s18 + $0xd0] sm:$0xff] }
 0x2d8   : > { %v1513_v17 = vadd.f32 %v3871_v15, %v1512_v16 }
 0x2da   : > { %v1600_v20 = vpack.c.bf16 %v1513_v17, %v1513_v17 }
 0x2db   : > { %v975_v28 = vpop.f32.mrf.mxu3 }
 0x2dc   : > { %v1605_v21 = vsel %vm923_vm0, %v1600_v20, 0  ;;  %v1429_v28 = vadd.f32 %v3872_v27, %v1428_v23 }
 0x2dd   : > { %1614 = vmatpush.bf16.xpose.msrb.mxu0 %v1605_v21 }
 0x2df   : > { %v1514_v22 = vpop.f32.mrf.mxu2 }
 0x2e6   : > { %3041 = vmatmul.msk.bf16.vlgmr.msrb.gmra.mxu3 %vm923_vm0, %v1261_v30  ;;  %v1432_v30 = vmul.f32 0.17677669, %v1429_v28 }
 0x2e7   : > { %1586 = vmatpush.bf16.msrb.mxu3 %v3715_v32 }
 0x2e8   : > { %v1599_v31 = vpack.c.bf16 %v1432_v30, %v1432_v30 }
 0x2eb   : > { %1587 = vmatpush.bf16.msrb.mxu3 %v3714_v33 }
 0x2ef   : > { %1588 = vmatpush.bf16.msrb.mxu3 %v3713_v36  ;;  %v3740_v36 = vld [vmem:[%s4930_s7 + $0xf0] sm:$0xff] }
 0x359   : > { %v4330_v34 = vpop.f32.mrf.mxu3 }
 0x361   : > { %v1008_v37 = vpop.f32.mrf.mxu3 }
 0x362   : > { %v1010_v37 = vadd.f32 %v3869_v35, %v4330_v34  ;;  %v3709_v34 = vld [vmem:[%s4930_s7 + $0x88] sm:$0xff]  ;;  %v3741_v35 = vld [vmem:[%s4930_s7 + $0xf8] sm:$0xff] }
 0x369   : > { %v1278_v40 = vpop.f32.mrf.mxu3 }
 0x36a   : > { %v1282_v41 = vsel %vm943_vm1, %v1278_v40, -inf }
 0x36b   : > { %1283 = vmax.xlane.f32.xlu1 %v1282_v41  ;;  %v3711_v41 = vld [vmem:[%s4930_s7 + $0x98] sm:$0xff] }
 0x371   : > { %v1280_v45 = vpop.f32.mrf.mxu3 }
 0x372   : > { %v3710_v45 = vld [vmem:[%s4930_s7 + $0x90] sm:$0xff] }
 0x3de   : > { %v1284_v52 = vpop.xlane.xlu1 %1283 }
 0x3df   : > { %v1285_v53 = vsub.f32 %v1278_v40, %v1284_v52  ;;  %v3712_v40 = vld [vmem:[%s4930_s7 + $0xa0] sm:$0xff]  ;;  %v3732_v52 = vld [vmem:[%s4928_s5 + $0xf0] sm:$0xff] }
 0x3e0   : > { %1589 = vmatpush.bf16.msrb.mxu3 %v3712_v40 }
 0x3e1   : > { %v1286_v56 = vmul.f32 1.442695, %v1285_v53  ;;  %v3731_v53 = vld [vmem:[%s4928_s5 + $0xe8] sm:$0xff] }
 0x3e3   : > { %3886 = vpow2.f32 %v1286_v56  ;;  %v3724_v56 = vld [vmem:[%s4973_s18 + $0xf0] sm:$0xff] }
 0x3e4   : > { %1590 = vmatpush.bf16.msrb.mxu3 %v3711_v41  ;;  %1758 = vmatpush.bf16.msrb.mxu2 %v3724_v56  ;;  %v3738_v41 = vld [vmem:[%s4930_s7 + $0xe0] sm:$0xff] }
 0x3e8   : > { %1591 = vmatpush.bf16.msrb.mxu3 %v3710_v45  ;;  %1759 = vmatpush.bf16.msrb.mxu2 %v3723_v57 }
 0x3e9   : > { %v3887_v60 = vpop.eup %3886 }
 0x3ea   : > { %v1288_v61 = vsel %vm943_vm1, %v3887_v60, 0.0 }
 0x3eb   : > { %1289 = vadd.xlane.f32.xlu1 %v1288_v61  ;;  %v3722_v61 = vld [vmem:[%s4973_s18 + $0xe0] sm:$0xff] }
 0x3ec   : > { %1592 = vmatpush.bf16.msrb.mxu3 %v3709_v34  ;;  %1760 = vmatpush.bf16.msrb.mxu2 %v3722_v61  ;;  %v3736_v34 = vld [vmem:[%s4930_s7 + $0xd0] sm:$0xff] }
 0x3ed   : > { %v3742_v61 = vld [vmem:[%s4932_s9 + $0x30] sm:$0xff] }
 0x3f0   : > { %1593 = vmatpush.bf16.msrb.mxu3 %v3708_v48  ;;  %1761 = vmatpush.bf16.msrb.mxu2 %v3721_v0  ;;  %v3734_v48 = vld [vmem:[%s4930_s7 + $0xc0] sm:$0xff] }
 0x3f4   : > { %1762 = vmatpush.bf16.msrb.mxu2 %v3720_v2 }
 0x45e   : > { %v1290_v11 = vpop.xlane.xlu1 %1289 }
 0x45f   : > { %3888 = vrcp.f32 %v1290_v11  ;;  %v3719_v11 = vld [vmem:[%s4973_s18 + $0xc8] sm:$0xff] }
 0x460   : > { %1763 = vmatpush.bf16.msrb.mxu2 %v3719_v11  ;;  %v3774_v11 = vld [vmem:[%s4936_s13 + $0xec] sm:$0xf0] }
 0x465   : > { %v3889_v12 = vpop.eup %3888 }
 0x466   : > { %v1292_v13 = vmul.f32 %v3889_v12, %v3887_v60  ;;  %v3717_v12 = vld [vmem:[%s4932_s9 + $0x28] sm:$0xff] }
 0x467   : > { %1679 = vmatpush.bf16.msrb.mxu1 %v3717_v12 }
 0x468   : > { %v1293_v14 = vpack.c.bf16 %v1292_v13, %v1292_v13  ;;  %v3716_v13 = vld [vmem:[%s4932_s9 + $0x20] sm:$0xff] }
 0x46a   : > { %3042 = vmatmul.msk.bf16.vlgmr.msra.gmra.mxu3 %vm943_vm1, %v1293_v14 }
 0x46b   : > { %1841 = vmatpush.bf16.msra.mxu3 %v3733_v50  ;;  %1680 = vmatpush.bf16.msrb.mxu1 %v3716_v13  ;;  %v3502_v13 = vld [vmem:[%s4936_s13 + $0xe8] sm:$0xf] }
 0x46f   : > { %1842 = vmatpush.bf16.msra.mxu3 %v3732_v52 }
 0x473   : > { %1843 = vmatpush.bf16.msra.mxu3 %v3731_v53 }
 0x477   : > { %1844 = vmatpush.bf16.msra.mxu3 %v3730_v54 }
 0x47a   : > { %1594 = vmatmul.bf16.vlgmr.msrb.gmra.mxu3 %v4247_v43 }
 0x47b   : > { %1845 = vmatpush.bf16.msra.mxu3 %v3729_v55  ;;  %v3876_v55 = vld [vmem:[%s4931_s8 + $0x3] ss:$0 sm:$0xff] }
 0x47f   : > { %1846 = vmatpush.bf16.msra.mxu3 %v3728_v58 }
 0x483   : > { %1847 = vmatpush.bf16.msra.mxu3 %v3727_v63 }
 0x487   : > { %1848 = vmatpush.bf16.msra.mxu3 %v3726_v1 }
 0x48a   : > { %1849 = vmatmul.bf16.vlgmr.msra.gmra.mxu3 %v4202_v19  ;;  %v3718_v19 = vld [vmem:[%s4973_s18 + $0xc0] sm:$0xff] }
 0x48b   : > { %1764 = vmatpush.bf16.msrb.mxu2 %v3718_v19  ;;  %v3772_v19 = vld [vmem:[%s4936_s13 + $0xe4] sm:$0xf] }
 0x48e   : > { %1765 = vmatmul.bf16.vlgmr.msrb.gmra.mxu2 %v4200_v18  ;;  %v3874_v18 = vld [vmem:[%s4929_s6 + $0x3] ss:$0 sm:$0xff] }
 0x4ed   : > { %v1310_v25 = vpop.f32.mrf.mxu3 }
 0x4ee   : > { %v1314_v26 = vpack.c.bf16 %v1310_v25, %v1310_v25 }
 0x4f0   : > { %3055 = vmatmul.msk.bf16.vlgmr.msra.gmra.mxu0 %vm923_vm0, %v1314_v26 }
 0x4f5   : > { %v1312_v29 = vpop.f32.mrf.mxu3 }
 0x4f6   : > { %v3875_v29 = vld [vmem:[%s4976_s4 + $0x3] ss:$0 sm:$0xff]  ;;  %s2680_s4 = sshll.u32 %s2676_s23, 4  ;;  %s2681_s4 = int_to_ptr.hbm [resolvable:$true] %s2680_s4 }
 0x4f7   : > { %s3918_s2 = sshra.s32 %s2681_s4, 4  ;;  %s3919_s2 = int_to_ptr.hbm [resolvable:$true] %s3918_s2 }
 0x4f8   : > { %p3925_p1 = scmp.lt.s32.totalorder %s3919_s2, %s4979_s26 }
 0x4fd   : > { %v1595_v6 = vpop.f32.mrf.mxu3 }
 0x4fe   : > { %v1596_v7 = vadd.f32 %v3873_v5, %v1595_v6 }
 0x500   : > { %3203 = vmatmul.msk.bf16.vlgmr.msrb.gmra.mxu0 %vm923_vm0, %v1599_v31  ;;  %v1632_v8 = vpack.c.bf16 %v1596_v7, %v1596_v7 }
 0x502   : > { %v1637_v9 = vsel %vm960_vm2, %v1632_v8, 0 }
 0x503   : > { %1646 = vmatpush.bf16.msra.mxu0 %v1637_v9  ;;  %v3984_v9 = vmov 128.0  }
 0x505   : > { %v1597_v10 = vpop.f32.mrf.mxu3 }
 0x506   : > { %v3494_v10 = vld [vmem:[%s4936_s13 + $0xe0] sm:$0xf] }
 0x507   : > { %1924 = vmatpush.bf16.msrb.mxu0 %v3741_v35  ;;  %v3495_v12 = vor.u32 %v3774_v11, %v3494_v10  ;;  %v3759_v10 = vld [vmem:[%s4936_s13 + $0x74] sm:$0xf0] }
 0x509   : > { %2263 = vmatpush.bf16.msrb.mxu3 %v3495_v12  ;;  %v3757_v12 = vld [vmem:[%s4936_s13 + $0x6c] sm:$0xf] }
 0x50b   : > { %1925 = vmatpush.bf16.msrb.mxu0 %v3740_v36  ;;  %v3480_v36 = vld [vmem:[%s4936_s13 + $0xd0] sm:$0xf0] }
 0x50d   : > { %v1850_v20 = vpop.f32.mrf.mxu3 }
 0x50e   : > { %v1851_v21 = vadd.f32 %v3874_v18, %v1850_v20  ;;  %v3504_v18 = vld [vmem:[%s4936_s13 + $0xf8] sm:$0xf0] }
 0x510   : > { %v1938_v22 = vpack.c.bf16 %v1851_v21, %v1851_v21 }
 0x511   : > { %v1766_v25 = vpop.f32.mrf.mxu2 }
 0x512   : > { %v1943_v23 = vsel %vm923_vm0, %v1938_v22, 0  ;;  %v1767_v30 = vadd.f32 %v3875_v29, %v1766_v25 }
 0x513   : > { %1952 = vmatpush.bf16.xpose.msra.mxu1 %v1943_v23 }
 0x514   : > { %v1770_v32 = vmul.f32 0.17677669, %v1767_v30 }
 0x515   : > { %v1852_v24 = vpop.f32.mrf.mxu3 }
 0x516   : > { %v1937_v33 = vpack.c.bf16 %v1770_v32, %v1770_v32  ;;  %v3770_v32 = vld [vmem:[%s4936_s13 + $0xcc] sm:$0xf0] }
 0x519   : > { %v1768_v26 = vpop.f32.mrf.mxu2 }
 0x56d   : > { %v1344_v38 = vpop.f32.mrf.mxu0 }
 0x56e   : > { %v4433_v39 = vadd.f32 %v1344_v38, %v1010_v37  ;;  %v3739_v37 = vld [vmem:[%s4930_s7 + $0xe8] sm:$0xff] }
 0x56f   : > { %1926 = vmatpush.bf16.msrb.mxu0 %v3739_v37  ;;  %v3486_v37 = vld [vmem:[%s4936_s13 + $0xc8] sm:$0xf] }
 0x573   : > { %1927 = vmatpush.bf16.msrb.mxu0 %v3738_v41 }
 0x575   : > { %v1346_v44 = vpop.f32.mrf.mxu0 }
 0x576   : > { %v3737_v44 = vld [vmem:[%s4930_s7 + $0xd8] sm:$0xff] }
 0x577   : > { %1928 = vmatpush.bf16.msrb.mxu0 %v3737_v44  ;;  %v3769_v44 = vld [vmem:[%s4936_s13 + $0xcc] sm:$0xf] }
 0x57b   : > { %1929 = vmatpush.bf16.msrb.mxu0 %v3736_v34 }
 0x57d   : > { %v1616_v46 = vpop.f32.mrf.mxu0 }
 0x57e   : > { %v1620_v47 = vsel %vm943_vm1, %v1616_v46, -inf }
 0x57f   : > { %1621 = vmax.xlane.f32.xlu2 %v1620_v47 }
 0x585   : > { %v1618_v49 = vpop.f32.mrf.mxu0 }
 0x5f2   : > { %v1622_v59 = vpop.xlane.xlu2 %1621 }
 0x5f3   : > { %v1623_v60 = vsub.f32 %v1616_v46, %v1622_v59 }
 0x5f5   : > { %v1624_v62 = vmul.f32 1.442695, %v1623_v60 }
 0x5f7   : > { %3890 = vpow2.f32 %v1624_v62 }
 0x5fd   : > { %v3891_v3 = vpop.eup %3890 }
 0x5fe   : > { %v1626_v4 = vsel %vm943_vm1, %v3891_v3, 0.0 }
 0x5ff   : > { %1627 = vadd.xlane.f32.xlu2 %v1626_v4 }
 0x672   : > { %v1628_v14 = vpop.xlane.xlu2 %1627 }
 0x673   : > { %3892 = vrcp.f32 %v1628_v14  ;;  %v3775_v14 = vld [vmem:[%s4936_s13 + $0xf4] sm:$0xf0] }
 0x679   : > { %v3893_v15 = vpop.eup %3892 }
 0x67a   : > { %v1630_v16 = vmul.f32 %v3893_v15, %v3891_v3 }
 0x67c   : > { %v1631_v17 = vpack.c.bf16 %v1630_v16, %v1630_v16  ;;  %v3503_v16 = vor.u32 %v3775_v14, %v3502_v13  ;;  %v3414_v14 = vld [vmem:[%s4936_s13 + $0x40] sm:$0xf] }
 0x67e   : > { %3204 = vmatmul.msk.bf16.vlgmr.msra.gmra.mxu0 %vm943_vm1, %v1631_v17  ;;  %v3773_v17 = vld [vmem:[%s4936_s13 + $0xec] sm:$0xf] }
 0x67f   : > { %v3507_v20 = vor.u32 %v3773_v17, %v3504_v18  ;;  %v3416_v18 = vld [vmem:[%s4936_s13 + $0x50] sm:$0xf0] }
 0x6fb   : > { %v1648_v27 = vpop.f32.mrf.mxu0 }
 0x6fc   : > { %v1652_v28 = vpack.c.bf16 %v1648_v27, %v1648_v27 }
 0x6fe   : > { %3217 = vmatmul.msk.bf16.vlgmr.msrb.gmra.mxu1 %vm923_vm0, %v1652_v28 }
 0x703   : > { %v1650_v31 = vpop.f32.mrf.mxu0 }
 0x704   : > { %v3478_v31 = vld [vmem:[%s4936_s13 + $0xc0] sm:$0xf] }
 0x705   : > { %v3479_v35 = vor.u32 %v3770_v32, %v3478_v31  ;;  %v3748_v31 = vld [vmem:[%s4936_s13 + $0x24] sm:$0xf] }
 0x707   : > { %2264 = vmatpush.bf16.msrb.mxu3 %v3479_v35  ;;  %v3406_v35 = vld [vmem:[%s4936_s13 + $0x28] sm:$0xf] }
 0x70e   : > { %3365 = vmatmul.msk.bf16.vlgmr.msra.gmra.mxu1 %vm923_vm0, %v1937_v33  ;;  %v3768_v33 = vld [vmem:[%s4936_s13 + $0xc4] sm:$0xf] }
 0x77b   : > { %v1682_v38 = vpop.f32.mrf.mxu1 }
 0x77c   : > { %v1686_v40 = vadd.f32 %v1682_v38, %v4433_v39  ;;  %v3735_v39 = vld [vmem:[%s4930_s7 + $0xc8] sm:$0xff]  ;;  %v3771_v38 = vld [vmem:[%s4936_s13 + $0xd4] sm:$0xf0] }
 0x77d   : > { %1930 = vmatpush.bf16.msrb.mxu0 %v3735_v39  ;;  %v3487_v41 = vor.u32 %v3771_v38, %v3486_v37  ;;  %v3462_v39 = vld [vmem:[%s4936_s13 + $0xa0] sm:$0xf] }
 0x781   : > { %1931 = vmatpush.bf16.msrb.mxu0 %v3734_v48 }
 0x783   : > { %v1684_v45 = vpop.f32.mrf.mxu1 }
 0x784   : > { %1932 = vmatmul.bf16.vlgmr.msrb.gmra.mxu0 %v4247_v43  ;;  %v3743_v43 = vld [vmem:[%s4932_s9 + $0x38] sm:$0xff] }
 0x785   : > { %2017 = vmatpush.bf16.msra.mxu2 %v3743_v43  ;;  %v3488_v45 = vld [vmem:[%s4936_s13 + $0xd8] sm:$0xf0]  ;;  %v3448_v43 = vld [vmem:[%s4936_s13 + $0x90] sm:$0xf0] }
 0x786   : > { %v3491_v34 = vor.u32 %v3769_v44, %v3488_v45  ;;  %v3382_v44 = vld [vmem:[%s4936_s13] sm:$0xf] }
 0x789   : > { %2018 = vmatpush.bf16.msra.mxu2 %v3742_v61  ;;  %v3454_v61 = vld [vmem:[%s4936_s13 + $0x88] sm:$0xf] }
 0x78b   : > { %v1954_v46 = vpop.f32.mrf.mxu1 }
 0x78c   : > { %v1958_v47 = vsel %vm943_vm1, %v1954_v46, -inf }
 0x78d   : > { %1959 = vmax.xlane.f32.xlu0 %v1958_v47  ;;  %2302 = vmatpush.bf16.msrb.mxu2 %v3507_v20  ;;  %v3764_v47 = vld [vmem:[%s4936_s13 + $0xa4] sm:$0xf]  ;;  %v3422_v20 = vld [vmem:[%s4936_s13 + $0x48] sm:$0xf] }
 0x791   : > { %2303 = vmatpush.bf16.msrb.mxu2 %v3491_v34  ;;  %v3746_v34 = vld [vmem:[%s4936_s13 + $0xc] sm:$0xf0] }
 0x793   : > { %v1956_v49 = vpop.f32.mrf.mxu1 }
 0x794   : > { %v3464_v49 = vld [vmem:[%s4936_s13 + $0xb0] sm:$0xf0] }
 0x800   : > { %v1960_v50 = vpop.xlane.xlu0 %1959 }
 0x801   : > { %v1961_v51 = vsub.f32 %v1954_v46, %v1960_v50  ;;  %v1933_v56 = vpop.f32.mrf.mxu0  ;;  %v3766_v46 = vld [vmem:[%s4936_s13 + $0xac] sm:$0xf0]  ;;  %v3470_v50 = vld [vmem:[%s4936_s13 + $0xa8] sm:$0xf] }
 0x802   : > { %v1934_v57 = vadd.f32 %v3876_v55, %v1933_v56  ;;  %v3463_v48 = vor.u32 %v3766_v46, %v3462_v39  ;;  %v3472_v55 = vld [vmem:[%s4936_s13 + $0xb8] sm:$0xf0]  ;;  %v3744_v39 = vld [vmem:[%s4936_s13 + $0x4] sm:$0xf]  ;;  %v3384_v46 = vld [vmem:[%s4936_s13 + $0x10] sm:$0xf0] }
 0x803   : > { %v1962_v52 = vmul.f32 1.442695, %v1961_v51  ;;  %v3767_v51 = vld [vmem:[%s4936_s13 + $0xb4] sm:$0xf0] }
 0x804   : > { %v1970_v58 = vpack.c.bf16 %v1934_v57, %v1934_v57  ;;  %2265 = vmatpush.bf16.msrb.mxu3 %v3463_v48  ;;  %v3446_v57 = vld [vmem:[%s4936_s13 + $0x80] sm:$0xf]  ;;  %v3387_v48 = vor.u32 %v3744_v39, %v3384_v46 }
 0x805   : > { %3894 = vpow2.f32 %v1962_v52  ;;  %v3467_v52 = vor.u32 %v3764_v47, %v3464_v49  ;;  %v3383_v47 = vor.u32 %v3746_v34, %v3382_v44  ;;  %v3390_v49 = vld [vmem:[%s4936_s13 + $0x8] sm:$0xf] }
 0x806   : > { %v1975_v59 = vsel %vm960_vm2, %v1970_v58, 0  ;;  %v3762_v58 = vld [vmem:[%s4936_s13 + $0x8c] sm:$0xf0] }
 0x807   : > { %1984 = vmatpush.bf16.msrb.mxu1 %v1975_v59  ;;  %v3760_v59 = vld [vmem:[%s4936_s13 + $0x84] sm:$0xf] }
 0x809   : > { %v1935_v60 = vpop.f32.mrf.mxu0 }
 0x80a   : > { %v3447_v60 = vor.u32 %v3762_v58, %v3446_v57  ;;  %v3799_v57 = vld [vmem:[%s4938_s15 + $0xb8] sm:$0xff] }
 0x80b   : > { %v3895_v53 = vpop.eup %3894  ;;  %2289 = vmatpush.bf16.msra.mxu1 %v3503_v16  ;;  %v3752_v16 = vld [vmem:[%s4936_s13 + $0x44] sm:$0xf] }
 0x80c   : > { %v1964_v54 = vsel %vm943_vm1, %v3895_v53, 0.0  ;;  %2266 = vmatpush.bf16.msrb.mxu3 %v3447_v60  ;;  %v3807_v60 = vld [vmem:[%s4938_s15 + $0xf8] sm:$0xff] }
 0x80d   : > { %1965 = vadd.xlane.f32.xlu1 %v1964_v54  ;;  %v3765_v54 = vld [vmem:[%s4936_s13 + $0xac] sm:$0xf] }
 0x80e   : > { %v3475_v56 = vor.u32 %v3765_v54, %v3472_v55 }
 0x80f   : > { %2290 = vmatpush.bf16.msra.mxu1 %v3487_v41  ;;  %v3408_v41 = vld [vmem:[%s4936_s13 + $0x38] sm:$0xf0] }
 0x810   : > { %2304 = vmatpush.bf16.msrb.mxu2 %v3475_v56  ;;  %v3791_v56 = vld [vmem:[%s4938_s15 + $0x78] sm:$0xff] }
 0x880   : > { %v1966_v62 = vpop.xlane.xlu1 %1965 }
 0x881   : > { %3896 = vrcp.f32 %v1966_v62  ;;  %v3763_v62 = vld [vmem:[%s4936_s13 + $0x94] sm:$0xf0] }
 0x882   : > { %3898 = vrcp.f32 %v3984_v9  ;;  %v3438_v9 = vld [vmem:[%s4936_s13 + $0x68] sm:$0xf] }
 0x887   : > { %v3897_v63 = vpop.eup %3896 }
 0x888   : > { %v1968_v0 = vmul.f32 %v3897_v63, %v3895_v53  ;;  %v3899_v21 = vpop.eup %3898  ;;  %v3471_v53 = vor.u32 %v3767_v51, %v3470_v50  ;;  %v3451_v63 = vor.u32 %v3760_v59, %v3448_v43  ;;  %v3747_v50 = vld [vmem:[%s4936_s13 + $0x14] sm:$0xf0]  ;;  %v3745_v51 = vld [vmem:[%s4936_s13 + $0xc] sm:$0xf]  ;;  %v3790_v43 = vld [vmem:[%s4938_s15 + $0x70] sm:$0xff] }
 0x889   : > { %v2029_v22 = vmul.f32 128.0, %v3899_v21  ;;  %vm2033_vm3 = vweird.f32 %v3899_v21  ;;  %v3783_v59 = vld [vmem:[%s4938_s15 + $0x38] sm:$0xff] }
 0x88a   : > { %v1969_v1 = vpack.c.bf16 %v1968_v0, %v1968_v0  ;;  %2291 = vmatpush.bf16.msra.mxu1 %v3471_v53  ;;  %v3455_v0 = vor.u32 %v3763_v62, %v3454_v61  ;;  %v3392_v53 = vld [vmem:[%s4936_s13 + $0x18] sm:$0xf0]  ;;  %v3798_v61 = vld [vmem:[%s4938_s15 + $0xb0] sm:$0xff] }
 0x88b   : > { %v2030_v23 = vsub.f32 1.0, %v2029_v22  ;;  %v3419_v22 = vor.u32 %v3752_v16, %v3416_v18  ;;  %v3395_v54 = vor.u32 %v3745_v51, %v3392_v53  ;;  %v3786_v16 = vld [vmem:[%s4938_s15 + $0x50] sm:$0xff] }
 0x88c   : > { %3366 = vmatmul.msk.bf16.vlgmr.msrb.gmra.mxu1 %vm943_vm1, %v1969_v1  ;;  %v3761_v1 = vld [vmem:[%s4936_s13 + $0x8c] sm:$0xf] }
 0x88d   : > { %v2031_v24 = vmul.f32 %v3899_v21, %v2030_v23 }
 0x88e   : > { %2292 = vmatpush.bf16.msra.mxu1 %v3455_v0  ;;  %v3806_v0 = vld [vmem:[%s4938_s15 + $0xf0] sm:$0xff] }
 0x88f   : > { %v2032_v25 = vadd.f32 %v3899_v21, %v2031_v24  ;;  %v3753_v24 = vld [vmem:[%s4936_s13 + $0x4c] sm:$0xf] }
 0x891   : > { %v4588_v26 = vsel %vm2033_vm3, %v3899_v21, %v2032_v25  ;;  %v3755_v21 = vld [vmem:[%s4936_s13 + $0x54] sm:$0xf0]  ;;  %v3424_v25 = vld [vmem:[%s4936_s13 + $0x58] sm:$0xf0] }
 0x892   : > { %v3423_v23 = vor.u32 %v3755_v21, %v3422_v20  ;;  %v3877_v20 = vld [vmem:[%s4934_s11] ss:$0 sm:$0xff] }
 0x909   : > { %v1986_v2 = vpop.f32.mrf.mxu1 }
 0x90a   : > { %v1990_v3 = vpack.c.bf16 %v1986_v2, %v1986_v2  ;;  %v3456_v2 = vld [vmem:[%s4936_s13 + $0x98] sm:$0xf0] }
 0x90c   : > { %3379 = vmatmul.msk.bf16.vlgmr.msra.gmra.mxu2 %vm923_vm0, %v1990_v3  ;;  %v3459_v3 = vor.u32 %v3761_v1, %v3456_v2  ;;  %v3789_v1 = vld [vmem:[%s4938_s15 + $0x68] sm:$0xff] }
 0x90d   : > { %v3797_v2 = vld [vmem:[%s4938_s15 + $0xa8] sm:$0xff] }
 0x90e   : > { %2305 = vmatpush.bf16.msrb.mxu2 %v3459_v3  ;;  %v3781_v3 = vld [vmem:[%s4938_s15 + $0x28] sm:$0xff] }
 0x911   : > { %v1988_v4 = vpop.f32.mrf.mxu1 }
 0x912   : > { %v3430_v4 = vld [vmem:[%s4936_s13 + $0x60] sm:$0xf] }
 0x98f   : > { %v2020_v5 = vpop.f32.mrf.mxu2 }
 0x990   : > { %v2024_v6 = vadd.f32 %v2020_v5, %v1686_v40  ;;  %v3483_v40 = vor.u32 %v3768_v33, %v3480_v36  ;;  %v3758_v5 = vld [vmem:[%s4936_s13 + $0x6c] sm:$0xf0]  ;;  %v3400_v33 = vld [vmem:[%s4936_s13 + $0x30] sm:$0xf0]  ;;  %v3751_v36 = vld [vmem:[%s4936_s13 + $0x34] sm:$0xf0] }
 0x991   : > { %v3403_v37 = vor.u32 %v3748_v31, %v3400_v33  ;;  %v3407_v38 = vor.u32 %v3751_v36, %v3406_v35  ;;  %v3802_v31 = vld [vmem:[%s4938_s15 + $0xd0] sm:$0xff]  ;;  %v3792_v33 = vld [vmem:[%s4938_s15 + $0x80] sm:$0xff]  ;;  %v3777_v35 = vld [vmem:[%s4938_s15 + $0x8] sm:$0xff] }
 0x992   : > { %v2025_v7 = vadd.f32 %v2024_v6, %v4243_v42  ;;  %v3496_v42 = vld [vmem:[%s4936_s13 + $0xf0] sm:$0xf0]  ;;  %v3756_v6 = vld [vmem:[%s4936_s13 + $0x64] sm:$0xf]  ;;  %v3801_v36 = vld [vmem:[%s4938_s15 + $0xc8] sm:$0xff] }
 0x993   : > { %v3499_v15 = vor.u32 %v3772_v19, %v3496_v42  ;;  %v3439_v19 = vor.u32 %v3759_v10, %v3438_v9  ;;  %v3440_v42 = vld [vmem:[%s4936_s13 + $0x78] sm:$0xf0]  ;;  %v3804_v9 = vld [vmem:[%s4938_s15 + $0xe0] sm:$0xff] }
 0x994   : > { %2026 = vadd.xlane.f32.xlu2 %v2025_v7  ;;  %v3443_v13 = vor.u32 %v3757_v12, %v3440_v42  ;;  %v3795_v12 = vld [vmem:[%s4938_s15 + $0x98] sm:$0xff] }
 0x995   : > { %2276 = vmatpush.bf16.msra.mxu0 %v3499_v15  ;;  %2293 = vmatpush.bf16.msra.mxu1 %v3439_v19  ;;  %v3754_v15 = vld [vmem:[%s4936_s13 + $0x4c] sm:$0xf0]  ;;  %v3787_v19 = vld [vmem:[%s4938_s15 + $0x58] sm:$0xff] }
 0x996   : > { %2306 = vmatpush.bf16.msrb.mxu2 %v3443_v13  ;;  %v3415_v17 = vor.u32 %v3754_v15, %v3414_v14  ;;  %v3779_v42 = vld [vmem:[%s4938_s15 + $0x18] sm:$0xff] }
 0x997   : > { %v2022_v8 = vpop.f32.mrf.mxu2  ;;  %v3803_v13 = vld [vmem:[%s4938_s15 + $0xd8] sm:$0xff] }
 0x998   : > { %v3432_v8 = vld [vmem:[%s4936_s13 + $0x70] sm:$0xf0] }
 0x999   : > { %2277 = vmatpush.bf16.msra.mxu0 %v3483_v40  ;;  %v3435_v11 = vor.u32 %v3756_v6, %v3432_v8  ;;  %2294 = vmatpush.bf16.msra.mxu1 %v3423_v23  ;;  %v3749_v40 = vld [vmem:[%s4936_s13 + $0x2c] sm:$0xf]  ;;  %v3796_v6 = vld [vmem:[%s4938_s15 + $0xa0] sm:$0xff] }
 0x99a   : > { %v3411_v45 = vor.u32 %v3749_v40, %v3408_v41  ;;  %v3780_v8 = vld [vmem:[%s4938_s15 + $0x20] sm:$0xff] }
 0x99b   : > { %v3878_v23 = vld [vmem:[%s4935_s12] ss:$0 sm:$0xff] }
 0x99c   : > { %v672_v40 = vld [vmem:[%s4937_s14] sm:$0xf] }
 0x99d   : > { %2278 = vmatpush.bf16.msra.mxu0 %v3467_v52  ;;  %2295 = vmatpush.bf16.msra.mxu1 %v3407_v38  ;;  %v3391_v52 = vor.u32 %v3747_v50, %v3390_v49  ;;  %v3800_v38 = vld [vmem:[%s4938_s15 + $0xc0] sm:$0xff]  ;;  %v2096_v41 = vperm.slane %v672_v40, 1  ;;  %v2097_v44 = vperm.slane %v672_v40, 2  ;;  %v2098_v50 = vperm.slane %v672_v40, 3 }
 0x9a1   : > { %2279 = vmatpush.bf16.msra.mxu0 %v3451_v63  ;;  %2296 = vmatpush.bf16.msra.mxu1 %v3391_v52  ;;  %v3782_v63 = vld [vmem:[%s4938_s15 + $0x30] sm:$0xff] }
 0x9a5   : > { %2280 = vmatpush.bf16.msra.mxu0 %v3435_v11  ;;  %2608 = vmatpush.bf16.msrb.mxu1 %v3799_v57 }
 0x9a9   : > { %2281 = vmatpush.bf16.msra.mxu0 %v3419_v22  ;;  %2609 = vmatpush.bf16.msrb.mxu1 %v3798_v61 }
 0x9ad   : > { %2282 = vmatpush.bf16.msra.mxu0 %v3403_v37  ;;  %2610 = vmatpush.bf16.msrb.mxu1 %v3797_v2  ;;  %v3776_v37 = vld [vmem:[%s4938_s15] sm:$0xff] }
 0x9b1   : > { %2283 = vmatpush.bf16.msra.mxu0 %v3387_v48  ;;  %2611 = vmatpush.bf16.msrb.mxu1 %v3796_v6  ;;  %v2095_v48 = vperm.slane %v672_v40, 0 }
 0x9b5   : > { %2595 = vmatpush.bf16.msrb.mxu0 %v3791_v56  ;;  %2612 = vmatpush.bf16.msrb.mxu1 %v3795_v12 }
 0x9b9   : > { %2596 = vmatpush.bf16.msrb.mxu0 %v3790_v43 }
 0x9bd   : > { %2597 = vmatpush.bf16.msrb.mxu0 %v3789_v1 }
 0xa07   : > { %v2027_v27 = vpop.xlane.xlu2 %2026 }
 0xa08   : > { %v2035_v28 = vmul.f32 %v4588_v26, %v2027_v27  ;;  %v3427_v27 = vor.u32 %v3753_v24, %v3424_v25 }
 0xa0a   : > { %v4591_v29 = vsub.f32 %v2025_v7, %v2035_v28  ;;  %v3431_v7 = vor.u32 %v3758_v5, %v3430_v4  ;;  %v3398_v28 = vld [vmem:[%s4936_s13 + $0x20] sm:$0xf]  ;;  %2307 = vmatpush.bf16.msrb.mxu2 %v3427_v27  ;;  %v3805_v4 = vld [vmem:[%s4938_s15 + $0xe8] sm:$0xff] }
 0xa0b   : > { %v3788_v5 = vld [vmem:[%s4938_s15 + $0x60] sm:$0xff] }
 0xa0c   : > { %v2037_v30 = vmul.f32 %v4591_v29, %v4591_v29  ;;  %2267 = vmatpush.bf16.msrb.mxu3 %v3431_v7  ;;  %2598 = vmatpush.bf16.msrb.mxu0 %v3788_v5 }
 0xa0e   : > { %2038 = vadd.xlane.f32.xlu0 %v2037_v30  ;;  %v3750_v30 = vld [vmem:[%s4936_s13 + $0x2c] sm:$0xf0]  ;;  %2308 = vmatpush.bf16.msrb.mxu2 %v3411_v45 }
 0xa0f   : > { %v3399_v32 = vor.u32 %v3750_v30, %v3398_v28  ;;  %v3785_v28 = vld [vmem:[%s4938_s15 + $0x48] sm:$0xff]  ;;  %v3778_v30 = vld [vmem:[%s4938_s15 + $0x10] sm:$0xff] }
 0xa10   : > { %2268 = vmatpush.bf16.msrb.mxu3 %v3415_v17  ;;  %2599 = vmatpush.bf16.msrb.mxu0 %v3787_v19  ;;  %v3794_v17 = vld [vmem:[%s4938_s15 + $0x90] sm:$0xff] }
 0xa11   : > { %2613 = vmatpush.bf16.msrb.mxu1 %v3794_v17 }
 0xa12   : > { %2309 = vmatpush.bf16.msrb.mxu2 %v3395_v54 }
 0xa14   : > { %2269 = vmatpush.bf16.msrb.mxu3 %v3399_v32  ;;  %2600 = vmatpush.bf16.msrb.mxu0 %v3786_v16  ;;  %v3784_v32 = vld [vmem:[%s4938_s15 + $0x40] sm:$0xff] }
 0xa16   : > { %2621 = vmatpush.bf16.msra.mxu2 %v3807_v60 }
 0xa18   : > { %2270 = vmatpush.bf16.msrb.mxu3 %v3383_v47  ;;  %2601 = vmatpush.bf16.msrb.mxu0 %v3785_v28 }
 0xa1a   : > { %2622 = vmatpush.bf16.msra.mxu2 %v3806_v0 }
 0xa1c   : > { %2582 = vmatpush.bf16.msra.mxu3 %v3783_v59  ;;  %2602 = vmatpush.bf16.msrb.mxu0 %v3784_v32 }
 0xa1e   : > { %2623 = vmatpush.bf16.msra.mxu2 %v3805_v4  ;;  %v3879_v4 = vld [vmem:[%s4939_s16] ss:$0 sm:$0xff] }
 0xa20   : > { %2583 = vmatpush.bf16.msra.mxu3 %v3782_v63 }
 0xa22   : > { %2624 = vmatpush.bf16.msra.mxu2 %v3804_v9 }
 0xa24   : > { %2584 = vmatpush.bf16.msra.mxu3 %v3781_v3 }
 0xa26   : > { %2625 = vmatpush.bf16.msra.mxu2 %v3803_v13 }
 0xa28   : > { %2585 = vmatpush.bf16.msra.mxu3 %v3780_v8 }
 0xa2a   : > { %2626 = vmatpush.bf16.msra.mxu2 %v3802_v31 }
 0xa2c   : > { %2586 = vmatpush.bf16.msra.mxu3 %v3779_v42 }
 0xa2e   : > { %2627 = vmatpush.bf16.msra.mxu2 %v3801_v36 }
 0xa30   : > { %2587 = vmatpush.bf16.msra.mxu3 %v3778_v30 }
 0xa32   : > { %2628 = vmatpush.bf16.msra.mxu2 %v3800_v38 }
 0xa34   : > { %2588 = vmatpush.bf16.msra.mxu3 %v3777_v35 }
 0xa38   : > { %2589 = vmatpush.bf16.msra.mxu3 %v3776_v37 }
 0xa81   : > { %v2039_v55 = vpop.xlane.xlu0 %2038 }
 0xa82   : > { %v2040_v58 = vmul.f32 %v2039_v55, %v4588_v26 }
 0xa84   : > { %v2041_v62 = vadd.f32 1e-05, %v2040_v58 }
 0xa86   : > { %3900 = vrsqrt.f32 %v2041_v62  ;;  %vm2048_vm5 = vweird.f32 %v2041_v62 }
 0xa8c   : > { %v3901_v7 = vpop.eup %3900 }
 0xa8d   : > { %v2043_v10 = vmul.f32 %v3901_v7, %v2041_v62  ;;  %vm2049_vm4 = vweird.f32 %v3901_v7 }
 0xa8e   : > { %vm2050_vm6 = vmor %vm2048_vm5, %vm2049_vm4 }
 0xa8f   : > { %v2044_v11 = vmul.f32 %v3901_v7, %v2043_v10 }
 0xa91   : > { %v2045_v14 = vmul.f32 0.5, %v2044_v11 }
 0xa93   : > { %v2046_v15 = vsub.f32 1.5, %v2045_v14 }
 0xa95   : > { %v2047_v18 = vmul.f32 %v3901_v7, %v2046_v15 }
 0xa97   : > { %v2051_v21 = vsel %vm2050_vm6, %v3901_v7, %v2047_v18 }
 0xa98   : > { %v2052_v22 = vmul.f32 %v2051_v21, %v4591_v29  ;;  %v3793_v29 = vld [vmem:[%s4938_s15 + $0x88] sm:$0xff] }
 0xa99   : > { %2614 = vmatpush.bf16.msrb.mxu1 %v3793_v29  ;;  %v3881_v29 = vld [vmem:[%s4981_s17] ss:$0 sm:$0xff] }
 0xa9a   : > { %v2056_v24 = vmul.f32 %v3877_v20, %v2052_v22 }
 0xa9c   : > { %v4837_v25 = vadd.f32 %v3878_v23, %v2056_v24 }
 0xa9d   : > { %2615 = vmatpush.bf16.msrb.mxu1 %v3792_v33 }
 0xa9e   : > { %v2061_v27 = vpack.c.bf16 %v4837_v25, %v4837_v25 }
 0xaa0   : > { %2271 = vmatmul.bf16.vlgmr.msrb.gmra.mxu3 %v2061_v27  ;;  %2284 = vmatmul.bf16.vlgmr.msra.gmra.mxu0 %v2061_v27 }
 0xaa1   : > { %2297 = vmatmul.bf16.vlgmr.msra.gmra.mxu1 %v2061_v27  ;;  %2310 = vmatmul.bf16.vlgmr.msrb.gmra.mxu2 %v2061_v27  ;;  %v3880_v27 = vld [vmem:[%s4978_s1] ss:$0 sm:$0xff]  ;;  %s3920_s1 = scalar_lea.hbm %s3919_s2, 8 }
 0xaa2   : > { %p3921_p12 = scmp.ne.s32.totalorder %s3919_s2, %s3920_s1  ;;  %p3926_p2 = scmp.lt.s32.totalorder %s3924_s3, %s3920_s1 }
 0xaa4   : > { %p3922_p13 = pnand %p3921_p12, %p4125_p4  ;;  %p3927_p3 = por %p3926_p2, %p3925_p1 }
 0xaa6   : > { %p3923_p0 = pneg %p3922_p13 }
 0xaa8   : > { %p3928_p5 = pnand %p3927_p3, %p3923_p0 }
 0xb1d   : > { %v2285_v45 = vpop.f32.mrf.mxu0 }
 0xb1e   : > { %v2286_v34 = vadd.f32 %v2285_v45, %v2096_v41  ;;  %v2298_v39 = vpop.f32.mrf.mxu1 }
 0xb1f   : > { %v2299_v46 = vadd.f32 %v2298_v39, %v2097_v44 }
 0xb20   : > { %v2316_v47 = vmax.f32 %v2286_v34, 0.0 }
 0xb21   : > { %v2317_v49 = vmax.f32 %v2299_v46, 0.0 }
 0xb22   : > { %v2320_v51 = vpack.c.bf16 %v2316_v47, %v2316_v47 }
 0xb23   : > { %v2321_v52 = vpack.c.bf16 %v2317_v49, %v2317_v49  ;;  %v2272_v53 = vpop.f32.mrf.mxu3 }
 0xb24   : > { %v2273_v54 = vadd.f32 %v2272_v53, %v2095_v48  ;;  %v2311_v55 = vpop.f32.mrf.mxu2  ;;  %2603 = vmatmul.bf16.vlgmr.msrb.gmra.mxu0 %v2320_v51 }
 0xb25   : > { %v2312_v56 = vadd.f32 %v2311_v55, %v2098_v50  ;;  %2616 = vmatmul.bf16.vlgmr.msrb.gmra.mxu1 %v2321_v52  ;;  %v2287_v57 = vpop.f32.mrf.mxu0 }
 0xb26   : > { %v2315_v58 = vmax.f32 %v2273_v54, 0.0  ;;  %v2300_v59 = vpop.f32.mrf.mxu1 }
 0xb27   : > { %v2318_v60 = vmax.f32 %v2312_v56, 0.0 }
 0xb28   : > { %v2319_v43 = vpack.c.bf16 %v2315_v58, %v2315_v58 }
 0xb29   : > { %v2322_v61 = vpack.c.bf16 %v2318_v60, %v2318_v60 }
 0xb2a   : > { %2590 = vmatmul.bf16.vlgmr.msra.gmra.mxu3 %v2319_v43 }
 0xb2b   : > { %2629 = vmatmul.bf16.vlgmr.msra.gmra.mxu2 %v2322_v61  ;;  %v2274_v62 = vpop.f32.mrf.mxu3 }
 0xb2c   : > { %v2313_v63 = vpop.f32.mrf.mxu2 }
 0xba1   : > { %v2604_v0 = vpop.f32.mrf.mxu0 }
 0xba2   : > { %v2617_v1 = vpop.f32.mrf.mxu1 }
 0xba9   : > { %v2606_v2 = vpop.f32.mrf.mxu0 }
 0xbaa   : > { %v2619_v3 = vpop.f32.mrf.mxu1 }
 0xbad   : > { %v2591_v5 = vpop.f32.mrf.mxu3 }
 0xbae   : > { %v2592_v6 = vadd.f32 %v3879_v4, %v2591_v5  ;;  %v2630_v7 = vpop.f32.mrf.mxu2 }
 0xbb0   : > { %v2605_v8 = vadd.f32 %v2604_v0, %v2592_v6 }
 0xbb2   : > { %v2618_v9 = vadd.f32 %v2617_v1, %v2605_v8 }
 0xbb4   : > { %v2631_v10 = vadd.f32 %v2630_v7, %v2618_v9 }
 0xbb5   : > { %v2593_v11 = vpop.f32.mrf.mxu3 }
 0xbb6   : > { %v2632_v19 = vpop.f32.mrf.mxu2  ;;  %v2634_v12 = vadd.f32 %v2631_v10, %v4837_v25 }
 0xbb8   : > { %2635 = vadd.xlane.f32.xlu1 %v2634_v12 }
 0xc2b   : > { %v2636_v42 = vpop.xlane.xlu1 %2635 }
 0xc2c   : > { %v2637_v13 = vmul.f32 %v2636_v42, %v4588_v26 }
 0xc2e   : > { %v2638_v14 = vsub.f32 %v2634_v12, %v2637_v13 }
 0xc30   : > { %v2639_v15 = vmul.f32 %v2638_v14, %v2638_v14 }
 0xc32   : > { %2640 = vadd.xlane.f32.xlu2 %v2639_v15 }
 0xca5   : > { %v2641_v16 = vpop.xlane.xlu2 %2640 }
 0xca6   : > { %v2642_v17 = vmul.f32 %v2641_v16, %v4588_v26 }
 0xca8   : > { %v2643_v18 = vadd.f32 1e-05, %v2642_v17 }
 0xcaa   : > { %3902 = vrsqrt.f32 %v2643_v18  ;;  %vm2650_vm8 = vweird.f32 %v2643_v18 }
 0xcb0   : > { %v3903_v20 = vpop.eup %3902 }
 0xcb1   : > { %v2645_v21 = vmul.f32 %v3903_v20, %v2643_v18  ;;  %vm2651_vm7 = vweird.f32 %v3903_v20 }
 0xcb2   : > { %vm2652_vm9 = vmor %vm2650_vm8, %vm2651_vm7 }
 0xcb3   : > { %v2646_v22 = vmul.f32 %v3903_v20, %v2645_v21 }
 0xcb5   : > { %v2647_v23 = vmul.f32 0.5, %v2646_v22 }
 0xcb7   : > { %v2648_v24 = vsub.f32 1.5, %v2647_v23 }
 0xcb9   : > { %v2649_v25 = vmul.f32 %v3903_v20, %v2648_v24 }
 0xcbb   : > { %v2653_v26 = vsel %vm2652_vm9, %v3903_v20, %v2649_v25 }
 0xcbc   : > { %v2654_v28 = vmul.f32 %v2653_v26, %v2638_v14 }
 0xcbe   : > { %v2658_v30 = vmul.f32 %v3880_v27, %v2654_v28 }
 0xcc0   : > { %v2662_v31 = vadd.f32 %v3881_v29, %v2658_v30 }
 0xcc2   : > { %2663 = vst [vmem:[%s641_s22] sm:$0xff] %v2662_v31 }
 0xcc3   : > { %3931 = shalt.err (!%p3928_p5)
}
 0xcc4   : > { %3808 = dma.vmem_to_hbm [thread:$0]  (%p4125_p4), %s2679_s21, 128, %s2681_s4, %s2665_s27  }
 0xcc5 PF: > { %s4982_s28 = sld [smem:[#allocation8_spill]] }
 0xcc6   : > { %s4983_s23 = sld [smem:[#allocation5_spill]] }
 0xccb   : > { %p3814_p6 = scmp.ge.s32.totalorder %s4982_s28, 2 }
 0xccc   : > { %s2692_s17 = sand.u32 1, %s4983_s23  }
 0xccd   : > { %p3811_p7 = pnand %p3814_p6, %p4132_p8  ;;  %s2693_s22 = scalar_lea.sflag [#allocation3], %s2692_s17 }
 0xccf   : > { %p3812_p9 = pneg %p3811_p7 }
 0xcd1   : > { %3957 = dma.done.wait (%p3812_p9), %s2693_s22, 128  }
 0xcd2   : > { %3959 = vsyncadd (%p3812_p9), %s2693_s22, 4294967168  ;;  %s32_s22 = sadd.s32 1, %s4982_s28   ;;  %s4985_s2 = sld [smem:[#allocation6_spill]] }
 0xcd3   : > { %p29_p10 = scmp.ge.s32.totalorder %s32_s22, 4   ;;  %s4986_s20 = sld [smem:[#allocation12_spill]] }
 0xcd4   : > { %s4987_s21 = sld [smem:[#allocation7_spill]]  ;;  %s4989_s0 = smov %s3966_s30 }
 0xcd5   : > { %s4988_s1 = sld [smem:[#allocation9_spill]]  ;;  %31 = sbr.rel (!%p29_p10) target bundleno = 13 (0xd), region = 159 }
 0xcd8   : > { %s4990_s30 = smov %s4985_s2 }
 0xcda   :  { %2699 = vsyncpa [#allocation3], 1 }
 0xcdb   :  { %2701 = vsyncpa [#allocation3 + $0x1], 1 }

</bundles_post_ra>
